<compile_context>
chip_gen: v7x
topology: tpu7x:2x2x1
jax: 0.10.0
libtpu: 0.0.40
codegen_flags: <defaults>
</compile_context>

<pallas_src>
import jax
import jax.numpy as jnp
from jax import lax
from jax.experimental import pallas as pl
from jax.experimental.pallas import tpu as pltpu

SUBLANE = 8  # f32/bf16 batch tiles kept as multiples of the sublane height


def _round_up(n, m):
    return ((n + m - 1) // m) * m


def sae_kernel(x_ref, w1_ref, b1_ref, w2_ref, w3_ref, b3_ref, w4_ref, b4_ref,
               o_ref):
    # Matmul operands may be bf16 (fast DMA path, all chip generations) or f32;
    # accumulation is always f32 on the MXU and every elementwise op (bias add,
    # ReLU) stays f32 (VPU-friendly on v5e, which has no bf16 VPU).
    prec = (lax.Precision.HIGHEST if x_ref.dtype == jnp.float32
            else lax.Precision.DEFAULT)

    # encoder: Linear(in, 64) -> ReLU -> Linear(64, enc)
    h1 = jnp.dot(x_ref[...], w1_ref[...],
                 preferred_element_type=jnp.float32, precision=prec)
    h1 = jnp.maximum(h1 + b1_ref[...], 0.0)
    z = jnp.dot(h1.astype(w2_ref.dtype), w2_ref[...],
                preferred_element_type=jnp.float32, precision=prec)
    # b2 has been folded into b3' = b2 @ w3 + b3 by prepare_params(): no add here.

    # decoder: Linear(enc, 64) -> ReLU -> Linear(64, in)
    h2 = jnp.dot(z.astype(w3_ref.dtype), w3_ref[...],
                 preferred_element_type=jnp.float32, precision=prec)
    h2 = jnp.maximum(h2 + b3_ref[...], 0.0)
    y = jnp.dot(h2.astype(w4_ref.dtype), w4_ref[...],
                preferred_element_type=jnp.float32, precision=prec)
    y = y + b4_ref[...]
    o_ref[...] = y.astype(o_ref.dtype)


def sae_forward(x, prepared, *, tb=512, min_grid_steps=4, out_dtype=None,
                vmem_limit_bytes=32 * 1024 * 1024):
    """Fused SAE forward pass.

    x: [B, input_size], ideally already in the same dtype as the prepared
       weights (then no wrapper-side copy of x is made at all).
    prepared: output of prepare_params() — weights [in, out] in compute dtype,
       biases [1, out] f32, with b2 already folded into b3.
    tb: max batch tile (rows per grid step); the picker shrinks it so the grid
       has at least `min_grid_steps` steps (>= 2 per TensorCore on v7x).
    out_dtype: output dtype; defaults to the compute (weight) dtype so the
       bf16 path also halves the writeback stream.
    """
    B, in_size = x.shape
    w1, b1 = prepared["w1"], prepared["b1"]
    w2 = prepared["w2"]
    w3, b3 = prepared["w3"], prepared["b3"]
    w4, b4 = prepared["w4"], prepared["b4"]
    hidden, enc = w1.shape[1], w2.shape[1]
    assert w1.shape[0] == in_size and w4.shape[1] == in_size

    cdt = w1.dtype
    if out_dtype is None:
        out_dtype = cdt
    if x.dtype != cdt:
        # Only happens if the caller didn't pre-cast; pass x in `cdt` to avoid it.
        x = x.astype(cdt)

    # Batch tile: <= tb, multiple of the sublane, and small enough that the
    # grid has >= min_grid_steps steps (so each v7x core gets >= 2 pipelined
    # steps and the x-in / y-out DMAs overlap compute).
    tb = max(SUBLANE, min(_round_up(tb, SUBLANE),
                          _round_up(pl.cdiv(B, min_grid_steps), SUBLANE)))
    B_p = _round_up(B, tb)
    if B_p != B:
        # Row pad only (lanes stay natural width); zero rows are exact through
        # every Linear/ReLU and are sliced off below. Not hit in the demo.
        x = jnp.pad(x, ((0, B_p - B), (0, 0)))
    grid = (B_p // tb,)

    # VMEM guard (matters most on v7x, 64 MiB): constant-index weight blocks
    # are double-buffered by default and the activations are tb-row slabs.
    # For production encoding sizes (>= ~16K) tile the enc axis with an extra
    # "arbitrary" grid dimension instead of keeping w2/w3 block-resident.
    itemsize = jnp.dtype(cdt).itemsize
    w_bytes = (in_size * hidden + hidden * enc + enc * hidden
               + hidden * in_size) * itemsize
    resident = (2 * w_bytes                                   # dbl-buffered weights
                + 2 * tb * in_size * (itemsize + jnp.dtype(out_dtype).itemsize)
                + 4 * tb * (2 * hidden + enc + in_size))      # f32 intermediates
    assert resident < vmem_limit_bytes, (
        "SAE weights/activations exceed the VMEM budget; tile encoding_size "
        "or shrink tb.")

    flops = 2 * B_p * (in_size * hidden + hidden * enc
                       + enc * hidden + hidden * in_size)
    bytes_accessed = (B_p * in_size * itemsize                       # x
                      + w_bytes                                      # weights
                      + (2 * hidden + in_size) * 4                   # biases (f32)
                      + B_p * in_size * jnp.dtype(out_dtype).itemsize)  # output

    full = lambda i: (0, 0)  # weights / biases stay block-resident across the grid

    out = pl.pallas_call(
        sae_kernel,
        out_shape=jax.ShapeDtypeStruct((B_p, in_size), out_dtype),
        grid_spec=pl.GridSpec(
            grid=grid,
            in_specs=[
                pl.BlockSpec((tb, in_size), lambda i: (i, 0)),  # x batch tile
                pl.BlockSpec(w1.shape, full),
                pl.BlockSpec(b1.shape, full),
                pl.BlockSpec(w2.shape, full),
                pl.BlockSpec(w3.shape, full),
                pl.BlockSpec(b3.shape, full),
                pl.BlockSpec(w4.shape, full),
                pl.BlockSpec(b4.shape, full),
            ],
            out_specs=pl.BlockSpec((tb, in_size), lambda i: (i, 0)),
        ),
        compiler_params=pltpu.CompilerParams(
            dimension_semantics=("parallel",),
            vmem_limit_bytes=vmem_limit_bytes),
        cost_estimate=pl.CostEstimate(
            flops=flops, transcendentals=0, bytes_accessed=bytes_accessed),
    )(x, w1, b1, w2, w3, b3, w4, b4)

    if B_p != B:
        out = out[:B]
    return out


def init_params(key, input_size, encoding_size, hidden=64):
    """Deterministic init matching nn.Linear default (U(-1/sqrt(in), 1/sqrt(in))).

    Weights stored transposed as [in, out]; biases as [1, out]. f32.
    """
    dims = [(input_size, hidden),      # encoder.0
            (hidden, encoding_size),   # encoder.2
            (encoding_size, hidden),   # decoder.0
            (hidden, input_size)]      # decoder.2
    params = {}
    for idx, (d_in, d_out) in enumerate(dims, start=1):
        key, kw, kb = jax.random.split(key, 3)
        bound = 1.0 / jnp.sqrt(d_in)
        params[f"w{idx}"] = jax.random.uniform(
            kw, (d_in, d_out), jnp.float32, minval=-bound, maxval=bound)
        params[f"b{idx}"] = jax.random.uniform(
            kb, (1, d_out), jnp.float32, minval=-bound, maxval=bound)
    return params


def prepare_params(params, compute_dtype=jnp.float32):
    """One-time per-model prep: cast matmul weights, keep biases f32, and fold
    b2 into b3 (b3' = b2 @ w3 + b3, exact) so the kernel skips one bias add
    and one input DMA."""
    b3_folded = params["b2"] @ params["w3"] + params["b3"]
    return {
        "w1": params["w1"].astype(compute_dtype),
        "b1": params["b1"].astype(jnp.float32),
        "w2": params["w2"].astype(compute_dtype),
        "w3": params["w3"].astype(compute_dtype),
        "b3": b3_folded.astype(jnp.float32),
        "w4": params["w4"].astype(compute_dtype),
        "b4": params["b4"].astype(jnp.float32),
    }


def sae_reference(x, p):
    """Pure-JAX reference (unfolded biases) for correctness checking."""
    h = jnp.maximum(x @ p["w1"] + p["b1"], 0.0)
    z = h @ p["w2"] + p["b2"]
    h = jnp.maximum(z @ p["w3"] + p["b3"], 0.0)
    return h @ p["w4"] + p["b4"]


if __name__ == "__main__":
    key = jax.random.PRNGKey(0)
    # Small but non-trivial shapes: batch 512 -> tile picker chooses tb=128,
    # grid of 4 steps (>= 2 per TensorCore on v7x, pipelined DMA).
    batch, input_size, encoding_size = 512, 32, 16

    key, kx = jax.random.split(key)
    x = jax.random.normal(kx, (batch, input_size), jnp.float32)
    params = init_params(key, input_size, encoding_size)

    ref = sae_reference(x, params)

    # f32 path (precision=HIGHEST inside the kernel): tight tolerance.
    prep_f32 = prepare_params(params, jnp.float32)
    out_f32 = jax.block_until_ready(sae_forward(x, prep_f32))
    assert out_f32.shape == (batch, input_size)
    assert out_f32.dtype == jnp.float32
    assert jnp.allclose(out_f32, ref, atol=1e-4, rtol=1e-4), "f32 mismatch"

    # bf16 path (valid on all generations incl. v5e): x, weights AND output are
    # bf16 (halved DMA bytes); bias add / ReLU / accumulation stay f32.
    prep_bf16 = prepare_params(params, jnp.bfloat16)
    x_bf16 = x.astype(jnp.bfloat16)  # pre-cast once; no copy inside sae_forward
    out_bf16 = jax.block_until_ready(sae_forward(x_bf16, prep_bf16))
    assert out_bf16.shape == (batch, input_size)
    assert out_bf16.dtype == jnp.bfloat16
    assert jnp.allclose(out_bf16.astype(jnp.float32), ref,
                        atol=1.5e-1, rtol=1.5e-1), "bf16 mismatch"

    print("KERNEL_OK")
</pallas_src>

<mosaic_0001>
module attributes {stable_mosaic.version = 11 : i64} {
  func.func @sae_kernel(%arg0: i32, %arg1: memref<128x32xf32, #tpu.memory_space<vmem>>, %arg2: memref<32x64xf32, #tpu.memory_space<vmem>>, %arg3: memref<1x64xf32, #tpu.memory_space<vmem>>, %arg4: memref<64x16xf32, #tpu.memory_space<vmem>>, %arg5: memref<16x64xf32, #tpu.memory_space<vmem>>, %arg6: memref<1x64xf32, #tpu.memory_space<vmem>>, %arg7: memref<64x32xf32, #tpu.memory_space<vmem>>, %arg8: memref<1x32xf32, #tpu.memory_space<vmem>>, %arg9: memref<128x32xf32, #tpu.memory_space<vmem>>) attributes {dimension_semantics = [#tpu.dimension_semantics<parallel>], iteration_bounds = array<i64: 4>, scalar_prefetch = 0 : i64, scratch_operands = 0 : i64, tpu.core_type = #tpu.core_type<tc>, window_params = [{transform_indices = @transform_0, window_bounds = array<i64: 128, 32>}, {pipeline_mode = #tpu.pipeline_mode<synchronous>, transform_indices = @transform_1, window_bounds = array<i64: 32, 64>}, {pipeline_mode = #tpu.pipeline_mode<synchronous>, transform_indices = @transform_2, window_bounds = array<i64: 1, 64>}, {pipeline_mode = #tpu.pipeline_mode<synchronous>, transform_indices = @transform_3, window_bounds = array<i64: 64, 16>}, {pipeline_mode = #tpu.pipeline_mode<synchronous>, transform_indices = @transform_4, window_bounds = array<i64: 16, 64>}, {pipeline_mode = #tpu.pipeline_mode<synchronous>, transform_indices = @transform_5, window_bounds = array<i64: 1, 64>}, {pipeline_mode = #tpu.pipeline_mode<synchronous>, transform_indices = @transform_6, window_bounds = array<i64: 64, 32>}, {pipeline_mode = #tpu.pipeline_mode<synchronous>, transform_indices = @transform_7, window_bounds = array<i64: 1, 32>}, {transform_indices = @transform_8, window_bounds = array<i64: 128, 32>}]} {
    %c0 = arith.constant 0 : index
    %c0_0 = arith.constant 0 : index
    %0 = vector.load %arg1[%c0, %c0_0] : memref<128x32xf32, #tpu.memory_space<vmem>>, vector<128x32xf32>
    %c0_1 = arith.constant 0 : index
    %c0_2 = arith.constant 0 : index
    %1 = vector.load %arg2[%c0_1, %c0_2] : memref<32x64xf32, #tpu.memory_space<vmem>>, vector<32x64xf32>
    %cst = arith.constant dense<0.000000e+00> : vector<128x64xf32>
    %2 = tpu.matmul %0, %1, %cst {dimension_numbers = #tpu.dot_dimension_numbers<[1], [0], [0], [1], [0, 0, 1, 1], [], []>, precision = #tpu.contract_precision<fp32>} : vector<128x32xf32>, vector<32x64xf32>, vector<128x64xf32> -> vector<128x64xf32>
    %c0_3 = arith.constant 0 : index
    %c0_4 = arith.constant 0 : index
    %3 = vector.load %arg3[%c0_3, %c0_4] : memref<1x64xf32, #tpu.memory_space<vmem>>, vector<1x64xf32>
    %4 = vector.broadcast %3 : vector<1x64xf32> to vector<128x64xf32>
    %5 = arith.addf %2, %4 : vector<128x64xf32>
    %cst_5 = arith.constant 0.000000e+00 : f32
    %6 = vector.broadcast %cst_5 : f32 to vector<128x64xf32>
    %7 = arith.maximumf %5, %6 : vector<128x64xf32>
    %c0_6 = arith.constant 0 : index
    %c0_7 = arith.constant 0 : index
    %8 = vector.load %arg4[%c0_6, %c0_7] : memref<64x16xf32, #tpu.memory_space<vmem>>, vector<64x16xf32>
    %cst_8 = arith.constant dense<0.000000e+00> : vector<128x16xf32>
    %9 = tpu.matmul %7, %8, %cst_8 {dimension_numbers = #tpu.dot_dimension_numbers<[1], [0], [0], [1], [0, 0, 1, 1], [], []>, precision = #tpu.contract_precision<fp32>} : vector<128x64xf32>, vector<64x16xf32>, vector<128x16xf32> -> vector<128x16xf32>
    %c0_9 = arith.constant 0 : index
    %c0_10 = arith.constant 0 : index
    %10 = vector.load %arg5[%c0_9, %c0_10] : memref<16x64xf32, #tpu.memory_space<vmem>>, vector<16x64xf32>
    %cst_11 = arith.constant dense<0.000000e+00> : vector<128x64xf32>
    %11 = tpu.matmul %9, %10, %cst_11 {dimension_numbers = #tpu.dot_dimension_numbers<[1], [0], [0], [1], [0, 0, 1, 1], [], []>, precision = #tpu.contract_precision<fp32>} : vector<128x16xf32>, vector<16x64xf32>, vector<128x64xf32> -> vector<128x64xf32>
    %c0_12 = arith.constant 0 : index
    %c0_13 = arith.constant 0 : index
    %12 = vector.load %arg6[%c0_12, %c0_13] : memref<1x64xf32, #tpu.memory_space<vmem>>, vector<1x64xf32>
    %13 = vector.broadcast %12 : vector<1x64xf32> to vector<128x64xf32>
    %14 = arith.addf %11, %13 : vector<128x64xf32>
    %cst_14 = arith.constant 0.000000e+00 : f32
    %15 = vector.broadcast %cst_14 : f32 to vector<128x64xf32>
    %16 = arith.maximumf %14, %15 : vector<128x64xf32>
    %c0_15 = arith.constant 0 : index
    %c0_16 = arith.constant 0 : index
    %17 = vector.load %arg7[%c0_15, %c0_16] : memref<64x32xf32, #tpu.memory_space<vmem>>, vector<64x32xf32>
    %cst_17 = arith.constant dense<0.000000e+00> : vector<128x32xf32>
    %18 = tpu.matmul %16, %17, %cst_17 {dimension_numbers = #tpu.dot_dimension_numbers<[1], [0], [0], [1], [0, 0, 1, 1], [], []>, precision = #tpu.contract_precision<fp32>} : vector<128x64xf32>, vector<64x32xf32>, vector<128x32xf32> -> vector<128x32xf32>
    %c0_18 = arith.constant 0 : index
    %c0_19 = arith.constant 0 : index
    %19 = vector.load %arg8[%c0_18, %c0_19] : memref<1x32xf32, #tpu.memory_space<vmem>>, vector<1x32xf32>
    %20 = vector.broadcast %19 : vector<1x32xf32> to vector<128x32xf32>
    %21 = arith.addf %18, %20 : vector<128x32xf32>
    %c0_20 = arith.constant 0 : index
    %c0_21 = arith.constant 0 : index
    %22 = vector.load %arg9[%c0_20, %c0_21] : memref<128x32xf32, #tpu.memory_space<vmem>>, vector<128x32xf32>
    tpu.vector_store %arg9[%c0_20, %c0_21], %21 {strides = array<i32>} : memref<128x32xf32, #tpu.memory_space<vmem>>, vector<128x32xf32>,
    return
  }
  func.func @transform_0(%arg0: i32) -> (i32, i32) {
    %c0_i32 = arith.constant 0 : i32
    %c0_i32_0 = arith.constant 0 : i32
    return %arg0, %c0_i32 : i32, i32
  }
  func.func @transform_1(%arg0: i32) -> (i32, i32) {
    %c0_i32 = arith.constant 0 : i32
    %c0_i32_0 = arith.constant 0 : i32
    %c0_i32_1 = arith.constant 0 : i32
    return %c0_i32, %c0_i32_0 : i32, i32
  }
  func.func @transform_2(%arg0: i32) -> (i32, i32) {
    %c0_i32 = arith.constant 0 : i32
    %c0_i32_0 = arith.constant 0 : i32
    %c0_i32_1 = arith.constant 0 : i32
    return %c0_i32, %c0_i32_0 : i32, i32
  }
  func.func @transform_3(%arg0: i32) -> (i32, i32) {
    %c0_i32 = arith.constant 0 : i32
    %c0_i32_0 = arith.constant 0 : i32
    %c0_i32_1 = arith.constant 0 : i32
    return %c0_i32, %c0_i32_0 : i32, i32
  }
  func.func @transform_4(%arg0: i32) -> (i32, i32) {
    %c0_i32 = arith.constant 0 : i32
    %c0_i32_0 = arith.constant 0 : i32
    %c0_i32_1 = arith.constant 0 : i32
    return %c0_i32, %c0_i32_0 : i32, i32
  }
  func.func @transform_5(%arg0: i32) -> (i32, i32) {
    %c0_i32 = arith.constant 0 : i32
    %c0_i32_0 = arith.constant 0 : i32
    %c0_i32_1 = arith.constant 0 : i32
    return %c0_i32, %c0_i32_0 : i32, i32
  }
  func.func @transform_6(%arg0: i32) -> (i32, i32) {
    %c0_i32 = arith.constant 0 : i32
    %c0_i32_0 = arith.constant 0 : i32
    %c0_i32_1 = arith.constant 0 : i32
    return %c0_i32, %c0_i32_0 : i32, i32
  }
  func.func @transform_7(%arg0: i32) -> (i32, i32) {
    %c0_i32 = arith.constant 0 : i32
    %c0_i32_0 = arith.constant 0 : i32
    %c0_i32_1 = arith.constant 0 : i32
    return %c0_i32, %c0_i32_0 : i32, i32
  }
  func.func @transform_8(%arg0: i32) -> (i32, i32) {
    %c0_i32 = arith.constant 0 : i32
    %c0_i32_0 = arith.constant 0 : i32
    return %arg0, %c0_i32 : i32, i32
  }
}

</mosaic_0001>

<bundles_post_ra>
// kernel: tpu_custom_call.1
= control target key start
LH: loop header
LB: loop body
LE: loop exit
PB: predicated region body
PF: predicated region fallthrough
CT: control target
= control target key end

     0   :  { %s7336_s27 = smov 0   ;;  %s8943_s0 = inlined_call_operand.vmem [shape: f32[512,32], index: 0, kind: input, shape index: {}]   ;;  %s8944_s1 = inlined_call_operand.vmem [shape: f32[32,64], index: 1, kind: input, shape index: {}]   ;;  %s8945_s2 = inlined_call_operand.vmem [shape: f32[1,64], index: 2, kind: input, shape index: {}]   ;;  %s8946_s3 = inlined_call_operand.vmem [shape: f32[64,16], index: 3, kind: input, shape index: {}]   ;;  %s8947_s4 = inlined_call_operand.vmem [shape: f32[16,64], index: 4, kind: input, shape index: {}]   ;;  %s8948_s5 = inlined_call_operand.vmem [shape: f32[1,64], index: 5, kind: input, shape index: {}]   ;;  %s8949_s6 = inlined_call_operand.vmem [shape: f32[64,32], index: 6, kind: input, shape index: {}]   ;;  %s8950_s7 = inlined_call_operand.vmem [shape: f32[1,32], index: 7, kind: input, shape index: {}]   ;;  %s8951_s8 = inlined_call_operand.vmem [shape: f32[512,32], index: 8, kind: output, shape index: {}]  }
   0x1 LB: > { %s5265_s28 = sadd.s32 4294967295, %s7289_s27   ;;  %p5269_p0 = scmp.ge.s32.totalorder %s7289_s27, 1  ;;  %s7289_s27 = sphi %s7336_s27, %s18_s27  }
   0x2   : > { %p263_p1 = scmp.lt.s32.totalorder %s7289_s27, 5 }
   0x4   : > { %p264_p2 = pnand %p5269_p0, %p263_p1 }
   0x5   : > { %v325_v0 = vld [vmem:[%s8944_s1] sm:$0xff] (!%p264_p2)  ;;  %v326_v1 = vld [vmem:[%s8944_s1 + $0x8] sm:$0xff] (!%p264_p2)  ;;  %v327_v2 = vld [vmem:[%s8944_s1 + $0x10] sm:$0xff] (!%p264_p2)  ;;  %s5270_s13 = sshll.u32 (!%p264_p2), %s5265_s28, 4  ;;  %vm336_vm0 = vcmask (!%p264_p2), 261120   ;;  %vm1539_vm1 = vcmask (!%p264_p2), 523264  }
   0x6   : > { %267 = sbr.rel (%p264_p2) target bundleno = 1598 (0x63e), region = 52  ;;  %v386_v3 = vand.u32 (!%p264_p2), 4294901760, %v325_v0  ;;  %v389_v4 = vand.u32 (!%p264_p2), 4294901760, %v326_v1  ;;  %v328_v5 = vld [vmem:[%s8944_s1 + $0x18] sm:$0xff] (!%p264_p2)  ;;  %v392_v6 = vand.u32 (!%p264_p2), 4294901760, %v327_v2  ;;  %p298_p3 = scmp.lt.s32.totalorder (!%p264_p2), %s5270_s13, 63 }
   0x7   : > { %v395_v7 = vand.u32 (!%p264_p2), 4294901760, %v328_v5  ;;  %vm2779_vm2 = vcmask (!%p264_p2), 130048  }
   0x8   : > { %v7356_v8 = vpack.c.bf16 (!%p264_p2), %v389_v4, %v386_v3  ;;  %v7360_v9 = vsub.f32 (!%p264_p2), %v325_v0, %v386_v3  ;;  %v7362_v10 = vsub.f32 (!%p264_p2), %v326_v1, %v389_v4  ;;  %v7364_v11 = vsub.f32 (!%p264_p2), %v327_v2, %v392_v6 }
   0x9   : > { %v7366_v12 = vpack.c.bf16 (!%p264_p2), %v395_v7, %v392_v6  ;;  %v7368_v13 = vsub.f32 (!%p264_p2), %v328_v5, %v395_v7 }
   0xa   : > { %6636 = vmatprep.subr.bf16.mxu0 (!%p264_p2), %v7356_v8  ;;  %v617_v14 = vand.u32 (!%p264_p2), 4294901760, %v7360_v9  ;;  %v624_v15 = vand.u32 (!%p264_p2), 4294901760, %v7362_v10  ;;  %v631_v16 = vand.u32 (!%p264_p2), 4294901760, %v7364_v11 }
   0xb   : > { %6638 = vmatpush3.bf16.msra.mxu0 (!%p264_p2), %v7356_v8  ;;  %v638_v17 = vand.u32 (!%p264_p2), 4294901760, %v7368_v13 }
   0xc   : > { %6640 = vmatprep.subr.bf16.mxu0 (!%p264_p2), %v7366_v12  ;;  %v618_v19 = vsub.f32 (!%p264_p2), %v7360_v9, %v617_v14  ;;  %v625_v20 = vsub.f32 (!%p264_p2), %v7362_v10, %v624_v15  ;;  %v7393_v23 = vsub.f32 (!%p264_p2), %v7364_v11, %v631_v16  ;;  %v7395_v24 = vpack.c.bf16 (!%p264_p2), %v624_v15, %v617_v14 }
   0xd   : > { %s9021_s13 = smov (!%p298_p3, %s5270_s13), 63  ;;  %v7406_v31 = vsub.f32 %v7368_v13, %v638_v17 }
   0xe   : > { %s5271_s16 = sshll.u32 %s9021_s13, 3  ;;  %v619_v33 = vand.u32 4294901760, %v618_v19  ;;  %v626_v34 = vand.u32 4294901760, %v625_v20 }
   0xf   : > { %s7381_s19 = scalar_lea.vmem %s8943_s0, %s5271_s16  ;;  %6642 = vmatpush3.bf16.msra.mxu0 %v7366_v12  ;;  %s8906_s26 = scalar_lea.vmem %s8951_s8, %s5271_s16 }
  0x10   : > { %v309_v18 = vld [vmem:[%s7381_s19] sm:$0xff]  ;;  %v310_v21 = vld [vmem:[%s7381_s19 + $0x8] sm:$0xff]  ;;  %v311_v22 = vld [vmem:[%s7381_s19 + $0x10] sm:$0xff]  ;;  %v6643_v42 = vpack.c.bf16 %v626_v34, %v619_v33 }
  0x11   : > { %v338_v25 = vsel %vm336_vm0, %v309_v18, 0  ;;  %v341_v26 = vsel %vm336_vm0, %v310_v21, 0  ;;  %v344_v27 = vsel %vm336_vm0, %v311_v22, 0  ;;  %v312_v28 = vld [vmem:[%s7381_s19 + $0x18] sm:$0xff]  ;;  %v313_v29 = vld [vmem:[%s7381_s19 + $0x20] sm:$0xff]  ;;  %v314_v30 = vld [vmem:[%s7381_s19 + $0x28] sm:$0xff] }
  0x12   : > { %v7408_v32 = vand.u32 4294901760, %v338_v25  ;;  %v7410_v35 = vand.u32 4294901760, %v341_v26  ;;  %v315_v36 = vld [vmem:[%s7381_s19 + $0x30] sm:$0xff]  ;;  %v7414_v37 = vand.u32 4294901760, %v344_v27  ;;  %v347_v38 = vsel %vm336_vm0, %v312_v28, 0  ;;  %v316_v45 = vld [vmem:[%s7381_s19 + $0x38] sm:$0xff]  ;;  %6644 = vmatprep.subr.bf16.mxu0 %v6643_v42 }
  0x13   : > { %v350_v39 = vsel %vm336_vm0, %v313_v29, 0  ;;  %v353_v40 = vsel %vm336_vm0, %v314_v30, 0  ;;  %v7425_v44 = vand.u32 4294901760, %v347_v38  ;;  %v356_v49 = vsel %vm336_vm0, %v315_v36, 0  ;;  %v317_v2 = vld [vmem:[%s7381_s19 + $0x40] sm:$0xff]  ;;  %v318_v19 = vld [vmem:[%s7381_s19 + $0x48] sm:$0xff] }
  0x14   : > { %v7420_v41 = vsub.f32 %v338_v25, %v7408_v32  ;;  %v7423_v43 = vsub.f32 %v341_v26, %v7410_v35  ;;  %v7429_v46 = vsub.f32 %v344_v27, %v7414_v37  ;;  %v7431_v47 = vand.u32 4294901760, %v350_v39  ;;  %v319_v20 = vld [vmem:[%s7381_s19 + $0x50] sm:$0xff]  ;;  %v320_v33 = vld [vmem:[%s7381_s19 + $0x58] sm:$0xff]  ;;  %v321_v34 = vld [vmem:[%s7381_s19 + $0x60] sm:$0xff] }
  0x15   : > { %v7433_v48 = vand.u32 4294901760, %v353_v40  ;;  %v7439_v52 = vsub.f32 %v347_v38, %v7425_v44  ;;  %v7441_v53 = vand.u32 4294901760, %v356_v49  ;;  %v359_v57 = vsel %vm336_vm0, %v316_v45, 0  ;;  %v322_v36 = vld [vmem:[%s7381_s19 + $0x68] sm:$0xff] }
  0x16   : > { %v456_v50 = vand.u32 4294901760, %v7420_v41  ;;  %v466_v51 = vand.u32 4294901760, %v7423_v43  ;;  %v476_v54 = vand.u32 4294901760, %v7429_v46  ;;  %v7445_v55 = vsub.f32 %v350_v39, %v7431_v47 }
  0x17   : > { %v7448_v56 = vsub.f32 %v353_v40, %v7433_v48  ;;  %v486_v60 = vand.u32 4294901760, %v7439_v52  ;;  %v7459_v61 = vsub.f32 %v356_v49, %v7441_v53  ;;  %v7466_v1 = vand.u32 4294901760, %v359_v57 }
  0x18   : > { %v457_v58 = vsub.f32 %v7420_v41, %v456_v50  ;;  %v467_v59 = vsub.f32 %v7423_v43, %v466_v51  ;;  %v477_v62 = vsub.f32 %v7429_v46, %v476_v54  ;;  %v496_v63 = vand.u32 4294901760, %v7445_v55 }
  0x19   : > { %v506_v0 = vand.u32 4294901760, %v7448_v56  ;;  %v487_v5 = vsub.f32 %v7439_v52, %v486_v60  ;;  %v516_v6 = vand.u32 4294901760, %v7459_v61  ;;  %v7480_v18 = vsub.f32 %v359_v57, %v7466_v1 }
  0x1a   : > { %v458_v3 = vand.u32 4294901760, %v457_v58  ;;  %v468_v4 = vand.u32 4294901760, %v467_v59  ;;  %v478_v7 = vand.u32 4294901760, %v477_v62  ;;  %v497_v14 = vsub.f32 %v7445_v55, %v496_v63 }
  0x1b   : > { %v507_v15 = vsub.f32 %v7448_v56, %v506_v0  ;;  %v488_v21 = vand.u32 4294901760, %v487_v5  ;;  %v362_v22 = vsel %vm336_vm0, %v317_v2, 0  ;;  %v633_v25 = vand.u32 4294901760, %v7393_v23  ;;  %v324_v5 = vld [vmem:[%s7381_s19 + $0x78] sm:$0xff] }
  0x1c   : > { %5803 = vmatprep.mubr.f32.mxu0 %v458_v3  ;;  %v7488_v26 = vpack.c.bf16 %v7362_v10, %v7360_v9  ;;  %v498_v27 = vand.u32 4294901760, %v497_v14  ;;  %v517_v28 = vsub.f32 %v7459_v61, %v516_v6  ;;  %v526_v29 = vand.u32 4294901760, %v7480_v18 }
  0x1d   : > { %5804 = vmatmul.mubr.f32.vlgmr.msra.gmra.mrb[0].mxu0 %v468_v4  ;;  %v7494_v30 = vand.u32 4294901760, %v362_v22  ;;  %v508_v23 = vand.u32 4294901760, %v507_v15  ;;  %v640_v9 = vand.u32 4294901760, %v7406_v31  ;;  %v365_v10 = vsel %vm336_vm0, %v318_v19, 0 }
  0x1e   : > { %6646 = vmatpush3.bf16.msra.mxu0 %v6643_v42  ;;  %5806 = vmatprep.mubr.f32.mxu0 %v478_v7  ;;  %v368_v38 = vsel %vm336_vm0, %v319_v20, 0  ;;  %v527_v39 = vsub.f32 %v7480_v18, %v526_v29  ;;  %v7508_v45 = vand.u32 4294901760, %v365_v10  ;;  %v323_v42 = vld [vmem:[%s7381_s19 + $0x70] sm:$0xff]  ;;  %v371_v31 = vsel %vm336_vm0, %v320_v33, 0 }
  0x1f   : > { %v7506_v40 = vsub.f32 %v362_v22, %v7494_v30  ;;  %v7510_v49 = vand.u32 4294901760, %v368_v38  ;;  %v6647_v57 = vpack.c.bf16 %v640_v9, %v633_v25  ;;  %v374_v58 = vsel %vm336_vm0, %v321_v34, 0 }
  0x20   : > { %v377_v59 = vsel %vm336_vm0, %v322_v36, 0  ;;  %v518_v62 = vand.u32 4294901760, %v517_v28  ;;  %v7518_v3 = vsub.f32 %v365_v10, %v7508_v45  ;;  %v7524_v7 = vand.u32 4294901760, %v371_v31 }
  0x21   : > { %5807 = vmatmul.mubr.f32.gmra.mrb[2].mxu0 %v488_v21  ;;  %v536_v2 = vand.u32 4294901760, %v7506_v40  ;;  %v7521_v4 = vsub.f32 %v368_v38, %v7510_v49  ;;  %6648 = vmatprep.subr.bf16.mxu0 %v6647_v57  ;;  %v7526_v14 = vand.u32 4294901760, %v374_v58  ;;  %v7528_v15 = vand.u32 4294901760, %v377_v59 }
  0x22   : > { %5809 = vmatprep.mubr.f32.mxu0 %v498_v27  ;;  %v380_v19 = vsel %vm336_vm0, %v323_v42, 0  ;;  %v546_v21 = vand.u32 4294901760, %v7518_v3  ;;  %6650 = vmatpush3.bf16.msra.mxu0 %v6647_v57  ;;  %v528_v27 = vand.u32 4294901760, %v527_v39  ;;  %v7539_v28 = vsub.f32 %v371_v31, %v7524_v7 }
  0x23   : > { %v537_v20 = vsub.f32 %v7506_v40, %v536_v2  ;;  %v556_v22 = vand.u32 4294901760, %v7521_v4  ;;  %v7536_v25 = vand.u32 4294901760, %v380_v19  ;;  %v7542_v33 = vsub.f32 %v374_v58, %v7526_v14  ;;  %6652 = vmatprep.subr.bf16.mxu0 %v7488_v26 }
  0x24   : > { %v383_v34 = vsel %vm336_vm0, %v324_v5, 0  ;;  %v547_v9 = vsub.f32 %v7518_v3, %v546_v21  ;;  %v7553_v38 = vsub.f32 %v377_v59, %v7528_v15  ;;  %v8952_v39 = vand.u32 4294901760, %v7539_v28 }
  0x25   : > { %5810 = vmatmul.mubr.f32.gmra.mrb[4].mxu0 %v508_v23  ;;  %v538_v36 = vand.u32 4294901760, %v537_v20  ;;  %v557_v10 = vsub.f32 %v7521_v4, %v556_v22  ;;  %v576_v42 = vand.u32 4294901760, %v7542_v33  ;;  %v7558_v57 = vsub.f32 %v380_v19, %v7536_v25 }
  0x26   : > { %5812 = vmatprep.mubr.f32.mxu0 %v518_v62  ;;  %v7560_v23 = vand.u32 4294901760, %v383_v34  ;;  %v7566_v31 = vpack.c.bf16 %v638_v17, %v631_v16  ;;  %v548_v58 = vand.u32 4294901760, %v547_v9  ;;  %v567_v59 = vsub.f32 %v7539_v28, %v8952_v39 }
  0x27   : > { %v586_v62 = vand.u32 4294901760, %v7553_v38  ;;  %v558_v19 = vand.u32 4294901760, %v557_v10  ;;  %v577_v20 = vsub.f32 %v7542_v33, %v576_v42  ;;  %v596_v16 = vand.u32 4294901760, %v7558_v57 }
  0x28   : > { %v7573_v5 = vsub.f32 %v383_v34, %v7560_v23  ;;  %v568_v17 = vand.u32 4294901760, %v567_v59 }
  0x29   : > { %5813 = vmatmul.mubr.f32.gmra.mrb[6].mxu0 %v528_v27  ;;  %v587_v27 = vsub.f32 %v7553_v38, %v586_v62  ;;  %v578_v39 = vand.u32 4294901760, %v577_v20  ;;  %v597_v34 = vsub.f32 %v7558_v57, %v596_v16 }
  0x2a   : > { %5815 = vmatprep.mubr.f32.mxu0 %v538_v36  ;;  %v606_v9 = vand.u32 4294901760, %v7573_v5 }
  0x2b   : > { %v588_v36 = vand.u32 4294901760, %v587_v27 }
  0x2c   : > { %v607_v10 = vsub.f32 %v7573_v5, %v606_v9 }
  0x2d   : > { %5816 = vmatmul.mubr.f32.gmra.mrb[8].mxu0 %v548_v58  ;;  %v598_v58 = vand.u32 4294901760, %v597_v34 }
  0x2e   : > { %5818 = vmatprep.mubr.f32.mxu0 %v558_v19  ;;  %v608_v59 = vand.u32 4294901760, %v607_v10  ;;  %v6655_v19 = vpack.c.bf16 %v7368_v13, %v7364_v11  ;;  %v8986_v11 = vand.u32 4294901760, %v7539_v28 }
  0x31   : > { %5819 = vmatmul.mubr.f32.gmra.mrb[10].mxu0 %v568_v17 }
  0x32   : > { %5821 = vmatprep.mubr.f32.mxu0 %v578_v39 }
  0x35   : > { %5822 = vmatmul.mubr.f32.gmra.mrb[12].mxu0 %v588_v36 }
  0x36   : > { %5824 = vmatprep.mubr.f32.mxu0 %v598_v58  ;;  %v7824_v58 = vld [vmem:[%s8945_s2] ss:$0 sm:$0xff] }
  0x39   : > { %5825 = vmatmul.mubr.f32.gmra.mrb[14].mxu0 %v608_v59 }
  0x3a   : > { %5835 = vmatprep.mubr.f32.mxu0 %v7408_v32 }
  0x3d   : > { %5836 = vmatmul.mubr.f32.vlgmr.msra.gmra.mrb[0].mxu0 %v7410_v35 }
  0x3e   : > { %6654 = vmatpush3.bf16.msra.mxu0 %v7488_v26  ;;  %5838 = vmatprep.mubr.f32.mxu0 %v7414_v37 }
  0x3f   : > { %6656 = vmatprep.subr.bf16.mxu0 %v6655_v19 }
  0x41   : > { %5839 = vmatmul.mubr.f32.gmra.mrb[2].mxu0 %v7425_v44 }
  0x42   : > { %5841 = vmatprep.mubr.f32.mxu0 %v7431_v47  ;;  %6658 = vmatpush3.bf16.msra.mxu0 %v6655_v19 }
  0x43   : > { %6660 = vmatprep.subr.bf16.mxu0 %v7356_v8 }
  0x45   : > { %5842 = vmatmul.mubr.f32.gmra.mrb[4].mxu0 %v7433_v48 }
  0x46   : > { %5844 = vmatprep.mubr.f32.mxu0 %v7441_v53 }
  0x49   : > { %5845 = vmatmul.mubr.f32.gmra.mrb[6].mxu0 %v7466_v1 }
  0x4a   : > { %5847 = vmatprep.mubr.f32.mxu0 %v7494_v30 }
  0x4d   : > { %5848 = vmatmul.mubr.f32.gmra.mrb[8].mxu0 %v7508_v45 }
  0x4e   : > { %5850 = vmatprep.mubr.f32.mxu0 %v7510_v49 }
  0x51   : > { %5851 = vmatmul.mubr.f32.gmra.mrb[10].mxu0 %v7524_v7 }
  0x52   : > { %5853 = vmatprep.mubr.f32.mxu0 %v7526_v14 }
  0x55   : > { %5854 = vmatmul.mubr.f32.gmra.mrb[12].mxu0 %v7528_v15 }
  0x56   : > { %5856 = vmatprep.mubr.f32.mxu0 %v7536_v25 }
  0x59   : > { %5857 = vmatmul.mubr.f32.gmra.mrb[14].mxu0 %v7560_v23 }
  0x5a   : > { %5867 = vmatprep.mubr.f32.mxu0 %v7420_v41 }
  0x5d   : > { %5868 = vmatmul.mubr.f32.vlgmr.msra.gmra.mrb[0].mxu0 %v7423_v43 }
  0x5e   : > { %6662 = vmatpush3.bf16.msra.mxu0 %v7356_v8  ;;  %5870 = vmatprep.mubr.f32.mxu0 %v7429_v46  ;;  %v1535_v46 = vld [vmem:[%s8946_s3 + $0x20] sm:$0xff] }
  0x5f   : > { %6664 = vmatprep.subr.bf16.mxu0 %v7366_v12 }
  0x61   : > { %5871 = vmatmul.mubr.f32.gmra.mrb[2].mxu0 %v7439_v52  ;;  %v1537_v52 = vld [vmem:[%s8946_s3 + $0x30] sm:$0xff] }
  0x62   : > { %5873 = vmatprep.mubr.f32.mxu0 %v7445_v55  ;;  %6666 = vmatpush3.bf16.msra.mxu0 %v7366_v12 }
  0x63   : > { %6668 = vmatprep.subr.bf16.mxu0 %v7395_v24 }
  0x65   : > { %5874 = vmatmul.mubr.f32.gmra.mrb[4].mxu0 %v7448_v56 }
  0x66   : > { %5876 = vmatprep.mubr.f32.mxu0 %v7459_v61 }
  0x69   : > { %5877 = vmatmul.mubr.f32.gmra.mrb[6].mxu0 %v7480_v18 }
  0x6a   : > { %5879 = vmatprep.mubr.f32.mxu0 %v7506_v40 }
  0x6d   : > { %5880 = vmatmul.mubr.f32.gmra.mrb[8].mxu0 %v7518_v3 }
  0x6e   : > { %5882 = vmatprep.mubr.f32.mxu0 %v7521_v4 }
  0x71   : > { %5883 = vmatmul.mubr.f32.gmra.mrb[10].mxu0 %v7539_v28 }
  0x72   : > { %5885 = vmatprep.mubr.f32.mxu0 %v7542_v33 }
  0x75   : > { %5886 = vmatmul.mubr.f32.gmra.mrb[12].mxu0 %v7553_v38 }
  0x76   : > { %5888 = vmatprep.mubr.f32.mxu0 %v7558_v57 }
  0x79   : > { %5889 = vmatmul.mubr.f32.gmra.mrb[14].mxu0 %v7573_v5 }
  0x7a   : > { %5899 = vmatprep.mubr.f32.mxu0 %v456_v50 }
  0x7d   : > { %5900 = vmatmul.mubr.f32.vlgmr.msra.gmra.mrb[0].mxu0 %v466_v51 }
  0x7e   : > { %6670 = vmatpush3.bf16.msra.mxu0 %v7395_v24  ;;  %5902 = vmatprep.mubr.f32.mxu0 %v476_v54  ;;  %v1607_v54 = vand.u32 4294901760, %v1537_v52 }
  0x7f   : > { %6672 = vmatprep.subr.bf16.mxu0 %v7566_v31 }
  0x80   : > { %v7789_v38 = vsub.f32 %v1537_v52, %v1607_v54 }
  0x81   : > { %5903 = vmatmul.mubr.f32.gmra.mrb[2].mxu0 %v486_v60 }
  0x82   : > { %5905 = vmatprep.mubr.f32.mxu0 %v496_v63  ;;  %6674 = vmatpush3.bf16.msra.mxu0 %v7566_v31 }
  0x83   : > { %6676 = vmatprep.subr.bf16.mxu0 %v7356_v8 }
  0x85   : > { %5906 = vmatmul.mubr.f32.gmra.mrb[4].mxu0 %v506_v0 }
  0x86   : > { %5908 = vmatprep.mubr.f32.mxu0 %v516_v6 }
  0x89   : > { %5909 = vmatmul.mubr.f32.gmra.mrb[6].mxu0 %v526_v29 }
  0x8a   : > { %5911 = vmatprep.mubr.f32.mxu0 %v536_v2 }
  0x8d   : > { %5912 = vmatmul.mubr.f32.gmra.mrb[8].mxu0 %v546_v21 }
  0x8e   : > { %5914 = vmatprep.mubr.f32.mxu0 %v556_v22 }
  0x91   : > { %5915 = vmatmul.mubr.f32.gmra.mrb[10].mxu0 %v8986_v11 }
  0x92   : > { %5917 = vmatprep.mubr.f32.mxu0 %v576_v42 }
  0x95   : > { %5918 = vmatmul.mubr.f32.gmra.mrb[12].mxu0 %v586_v62 }
  0x96   : > { %5920 = vmatprep.mubr.f32.mxu0 %v596_v16 }
  0x99   : > { %5921 = vmatmul.mubr.f32.gmra.mrb[14].mxu0 %v606_v9 }
  0x9a   : > { %5931 = vmatprep.mubr.f32.mxu0 %v7408_v32 }
  0x9d   : > { %5932 = vmatmul.mubr.f32.vlgmr.msra.gmra.mrb[0].mxu0 %v7410_v35 }
  0x9e   : > { %6678 = vmatpush3.bf16.msra.mxu0 %v7356_v8  ;;  %5934 = vmatprep.mubr.f32.mxu0 %v7414_v37  ;;  %v1531_v8 = vld [vmem:[%s8946_s3] sm:$0xff] }
  0x9f   : > { %6680 = vmatprep.subr.bf16.mxu0 %v7366_v12  ;;  %v1589_v13 = vand.u32 4294901760, %v1531_v8 }
  0xa1   : > { %5935 = vmatmul.mubr.f32.gmra.mrb[2].mxu0 %v7425_v44  ;;  %v7748_v60 = vsub.f32 %v1531_v8, %v1589_v13 }
  0xa2   : > { %5937 = vmatprep.mubr.f32.mxu0 %v7431_v47  ;;  %6682 = vmatpush3.bf16.msra.mxu0 %v7366_v12  ;;  %v1532_v12 = vld [vmem:[%s8946_s3 + $0x8] sm:$0xff] }
  0xa3   : > { %v1592_v24 = vand.u32 4294901760, %v1532_v12  ;;  %v1824_v63 = vand.u32 4294901760, %v7748_v60 }
  0xa5   : > { %5938 = vmatmul.mubr.f32.gmra.mrb[4].mxu0 %v7433_v48  ;;  %v7750_v61 = vsub.f32 %v1532_v12, %v1592_v24 }
  0xa6   : > { %5940 = vmatprep.mubr.f32.mxu0 %v7441_v53 }
  0xa7   : > { %v1831_v0 = vand.u32 4294901760, %v7750_v61  ;;  %v7807_v9 = vpack.c.bf16 %v7750_v61, %v7748_v60 }
  0xa9   : > { %5941 = vmatmul.mubr.f32.gmra.mrb[6].mxu0 %v7466_v1  ;;  %v1832_v6 = vsub.f32 %v7750_v61, %v1831_v0 }
  0xaa   : > { %5943 = vmatprep.mubr.f32.mxu0 %v7494_v30 }
  0xab   : > { %v1833_v26 = vand.u32 4294901760, %v1832_v6 }
  0xad   : > { %5944 = vmatmul.mubr.f32.gmra.mrb[8].mxu0 %v7508_v45 }
  0xae   : > { %5946 = vmatprep.mubr.f32.mxu0 %v7510_v49 }
  0xb1   : > { %5947 = vmatmul.mubr.f32.gmra.mrb[10].mxu0 %v7524_v7 }
  0xb2   : > { %5949 = vmatprep.mubr.f32.mxu0 %v7526_v14 }
  0xb5   : > { %5950 = vmatmul.mubr.f32.gmra.mrb[12].mxu0 %v7528_v15 }
  0xb6   : > { %5952 = vmatprep.mubr.f32.mxu0 %v7536_v25 }
  0xb9   : > { %5953 = vmatmul.mubr.f32.gmra.mrb[14].mxu0 %v7560_v23 }
  0xba   : > { %5963 = vmatprep.mubr.f32.mxu0 %v7408_v32  ;;  %v7706_v32 = vpack.c.bf16 %v1592_v24, %v1589_v13 }
  0xbc   : > { %6684 = vmatprep.subr.bf16.mxu0 %v7706_v32  ;;  %6899 = vmatprep.subr.bf16.mxu1 %v7706_v32 }
  0xbd   : > { %5964 = vmatmul.mubr.f32.vlgmr.msra.gmra.mrb[0].mxu0 %v7410_v35  ;;  %v1533_v35 = vld [vmem:[%s8946_s3 + $0x10] sm:$0xff]  ;;  %6903 = vmatpush3.bf16.msra.mxu1 %v7706_v32 }
  0xbe   : > { %5966 = vmatprep.mubr.f32.mxu0 %v7414_v37  ;;  %v1534_v37 = vld [vmem:[%s8946_s3 + $0x18] sm:$0xff]  ;;  %v1595_v41 = vand.u32 4294901760, %v1533_v35  ;;  %6686 = vmatpush3.bf16.msra.mxu0 %v7706_v32 }
  0xbf   : > { %v1598_v43 = vand.u32 4294901760, %v1534_v37 }
  0xc0   : > { %v7760_v29 = vsub.f32 %v1533_v35, %v1595_v41 }
  0xc1   : > { %5967 = vmatmul.mubr.f32.gmra.mrb[2].mxu0 %v7425_v44  ;;  %v7718_v44 = vpack.c.bf16 %v1598_v43, %v1595_v41 }
  0xc2   : > { %5969 = vmatprep.mubr.f32.mxu0 %v7431_v47  ;;  %v1536_v47 = vld [vmem:[%s8946_s3 + $0x28] sm:$0xff] }
  0xc3   : > { %6688 = vmatprep.subr.bf16.mxu0 %v7718_v44  ;;  %6900 = vmatprep.subr.bf16.mxu1 %v7718_v44  ;;  %v1604_v50 = vand.u32 4294901760, %v1536_v47 }
  0xc4   : > { %6690 = vmatpush3.bf16.msra.mxu0 %v7718_v44  ;;  %6904 = vmatpush3.bf16.msra.mxu1 %v7718_v44 }
  0xc5   : > { %5970 = vmatmul.mubr.f32.gmra.mrb[4].mxu0 %v7433_v48  ;;  %v1601_v48 = vand.u32 4294901760, %v1535_v46 }
  0xc6   : > { %5972 = vmatprep.mubr.f32.mxu0 %v7441_v53  ;;  %v1538_v53 = vld [vmem:[%s8946_s3 + $0x38] sm:$0xff] }
  0xc7   : > { %v7730_v51 = vpack.c.bf16 %v1604_v50, %v1601_v48  ;;  %v1610_v55 = vand.u32 4294901760, %v1538_v53  ;;  %v7775_v4 = vsub.f32 %v1535_v46, %v1601_v48 }
  0xc9   : > { %5973 = vmatmul.mubr.f32.gmra.mrb[6].mxu0 %v7466_v1  ;;  %6692 = vmatprep.subr.bf16.mxu0 %v7730_v51  ;;  %v7742_v56 = vpack.c.bf16 %v1610_v55, %v1607_v54  ;;  %v1825_v1 = vsub.f32 %v7748_v60, %v1824_v63  ;;  %v8960_v21 = vand.u32 4294901760, %v7775_v4  ;;  %v7791_v39 = vsub.f32 %v1538_v53, %v1610_v55 }
  0xca   : > { %5975 = vmatprep.mubr.f32.mxu0 %v7494_v30  ;;  %6901 = vmatprep.subr.bf16.mxu1 %v7730_v51  ;;  %v7762_v30 = vsub.f32 %v1534_v37, %v1598_v43 }
  0xcb   : > { %6694 = vmatpush3.bf16.msra.mxu0 %v7730_v51  ;;  %6905 = vmatpush3.bf16.msra.mxu1 %v7730_v51  ;;  %v1826_v18 = vand.u32 4294901760, %v1825_v1  ;;  %v1853_v28 = vsub.f32 %v7775_v4, %v8960_v21  ;;  %v8953_v31 = vand.u32 4294901760, %v7791_v39  ;;  %v7819_v10 = vpack.c.bf16 %v7791_v39, %v7789_v38 }
  0xcc   : > { %6696 = vmatprep.subr.bf16.mxu0 %v7742_v56  ;;  %6902 = vmatprep.subr.bf16.mxu1 %v7742_v56  ;;  %v7811_v34 = vpack.c.bf16 %v7762_v30, %v7760_v29  ;;  %v8987_v60 = vand.u32 4294901760, %v7762_v30 }
  0xcd   : > { %5976 = vmatmul.mubr.f32.gmra.mrb[8].mxu0 %v7508_v45  ;;  %v7764_v40 = vpack.c.bf16 %v1833_v26, %v1826_v18  ;;  %v1838_v45 = vand.u32 4294901760, %v7760_v29  ;;  %v1854_v42 = vand.u32 4294901760, %v1853_v28  ;;  %v1874_v20 = vsub.f32 %v7791_v39, %v8953_v31 }
  0xce   : > { %5978 = vmatprep.mubr.f32.mxu0 %v7510_v49  ;;  %v8965_v49 = vand.u32 4294901760, %v7762_v30 }
  0xcf   : > { %6698 = vmatpush3.bf16.msra.mxu0 %v7742_v56  ;;  %6906 = vmatpush3.bf16.msra.mxu1 %v7742_v56  ;;  %v1839_v2 = vsub.f32 %v7760_v29, %v1838_v45  ;;  %v1875_v17 = vand.u32 4294901760, %v1874_v20  ;;  %v6751_v61 = vpack.c.bf16 %v8987_v60, %v1838_v45  ;;  %v8995_v45 = vand.u32 4294901760, %v7791_v39 }
  0xd0   : > { %6700 = vmatprep.subr.bf16.mxu1 %v7764_v40  ;;  %v1846_v3 = vsub.f32 %v7762_v30, %v8965_v49  ;;  %v8994_v30 = vand.u32 4294901760, %v7789_v38 }
  0xd1   : > { %5979 = vmatmul.mubr.f32.gmra.mrb[10].mxu0 %v7524_v7  ;;  %v7777_v7 = vsub.f32 %v1536_v47, %v1604_v50 }
  0xd2   : > { %5981 = vmatprep.mubr.f32.mxu0 %v7526_v14  ;;  %v1840_v14 = vand.u32 4294901760, %v1839_v2 }
  0xd3   : > { %v8958_v22 = vand.u32 4294901760, %v7777_v7  ;;  %v7815_v36 = vpack.c.bf16 %v7777_v7, %v7775_v4 }
  0xd5   : > { %5982 = vmatmul.mubr.f32.gmra.mrb[12].mxu0 %v7528_v15  ;;  %v1847_v15 = vand.u32 4294901760, %v1846_v3  ;;  %v1860_v33 = vsub.f32 %v7777_v7, %v8958_v22 }
  0xd6   : > { %5984 = vmatprep.mubr.f32.mxu0 %v7536_v25 }
  0xd7   : > { %v7781_v25 = vpack.c.bf16 %v1847_v15, %v1840_v14  ;;  %v1861_v57 = vand.u32 4294901760, %v1860_v33 }
  0xd9   : > { %5985 = vmatmul.mubr.f32.gmra.mrb[14].mxu0 %v7560_v23  ;;  %v8954_v23 = vand.u32 4294901760, %v7789_v38  ;;  %v7795_v62 = vpack.c.bf16 %v1861_v57, %v1854_v42 }
  0xdb   : > { %v1867_v5 = vsub.f32 %v7789_v38, %v8954_v23 }
  0xdd   : > { %v1868_v16 = vand.u32 4294901760, %v1867_v5 }
  0xdf   : > { %v7803_v27 = vpack.c.bf16 %v1875_v17, %v1868_v16 }
 0x190   : > { %v5965_v59 = vpop.f32.mrb[0].mxu0 }
 0x191   : > { %v6907_v19 = vadd.f32 %v5965_v59, %v7824_v58  ;;  %v1421_v11 = vpop.f32.mrb[1].mxu0 }
 0x192   : > { %v6908_v8 = vadd.f32 %v7824_v58, %v1421_v11 }
 0x193   : > { %v1516_v12 = vmax.f32 %v6907_v19, 0.0 }
 0x194   : > { %v1515_v13 = vmax.f32 %v6908_v8, 0.0  ;;  %v5968_v24 = vpop.f32.mrb[2].mxu0 }
 0x195   : > { %v1544_v35 = vsel %vm1539_vm1, %v1516_v12, 0  ;;  %v6909_v37 = vadd.f32 %v5968_v24, %v7824_v58  ;;  %v1433_v41 = vpop.f32.mrb[3].mxu0 }
 0x196   : > { %v7830_v43 = vand.u32 4294901760, %v1544_v35  ;;  %v1541_v46 = vsel %vm1539_vm1, %v1515_v13, 0  ;;  %v6910_v47 = vadd.f32 %v7824_v58, %v1433_v41 }
 0x197   : > { %v7834_v48 = vand.u32 4294901760, %v1541_v46  ;;  %v1518_v50 = vmax.f32 %v6909_v37, 0.0 }
 0x198   : > { %v7837_v52 = vsub.f32 %v1544_v35, %v7830_v43  ;;  %v1517_v53 = vmax.f32 %v6910_v47, 0.0  ;;  %v5971_v54 = vpop.f32.mrb[4].mxu0 }
 0x199   : > { %v7840_v55 = vsub.f32 %v1541_v46, %v7834_v48  ;;  %v1550_v1 = vsel %vm1539_vm1, %v1518_v50, 0  ;;  %v6911_v6 = vadd.f32 %v5971_v54, %v7824_v58  ;;  %v1445_v18 = vpop.f32.mrb[5].mxu0 }
 0x19a   : > { %v8963_v26 = vand.u32 4294901760, %v7837_v52  ;;  %v7845_v2 = vand.u32 4294901760, %v1550_v1  ;;  %v1547_v3 = vsel %vm1539_vm1, %v1517_v53, 0  ;;  %v6912_v14 = vadd.f32 %v7824_v58, %v1445_v18 }
 0x19b   : > { %v7849_v15 = vand.u32 4294901760, %v1547_v3  ;;  %v1520_v28 = vmax.f32 %v6911_v6, 0.0  ;;  %v1663_v33 = vand.u32 4294901760, %v7840_v55 }
 0x19c   : > { %v1674_v42 = vsub.f32 %v7837_v52, %v8963_v26  ;;  %v7856_v57 = vsub.f32 %v1550_v1, %v7845_v2  ;;  %v1519_v5 = vmax.f32 %v6912_v14, 0.0  ;;  %v5974_v20 = vpop.f32.mrb[6].mxu0 }
 0x19d   : > { %v7859_v16 = vsub.f32 %v1547_v3, %v7849_v15  ;;  %v1556_v17 = vsel %vm1539_vm1, %v1520_v28, 0  ;;  %v6913_v59 = vadd.f32 %v5974_v20, %v7824_v58  ;;  %v1457_v19 = vpop.f32.mrb[7].mxu0  ;;  %v1664_v11 = vsub.f32 %v7840_v55, %v1663_v33 }
 0x19e   : > { %v7866_v8 = vand.u32 4294901760, %v1556_v17  ;;  %v1553_v12 = vsel %vm1539_vm1, %v1519_v5, 0  ;;  %v6914_v13 = vadd.f32 %v7824_v58, %v1457_v19  ;;  %v1675_v46 = vand.u32 4294901760, %v1674_v42 }
 0x19f   : > { %v7870_v24 = vand.u32 4294901760, %v1553_v12  ;;  %v1522_v35 = vmax.f32 %v6913_v59, 0.0  ;;  %v1665_v37 = vand.u32 4294901760, %v1664_v11  ;;  %v8961_v41 = vand.u32 4294901760, %v7859_v16 }
 0x1a0   : > { %v7874_v47 = vsub.f32 %v1556_v17, %v7866_v8  ;;  %v1521_v50 = vmax.f32 %v6914_v13, 0.0  ;;  %v5977_v53 = vpop.f32.mrb[8].mxu0  ;;  %v8956_v54 = vand.u32 4294901760, %v7856_v57 }
 0x1a1   : > { %v7878_v1 = vsub.f32 %v1553_v12, %v7870_v24  ;;  %v1562_v6 = vsel %vm1539_vm1, %v1522_v35, 0  ;;  %v6915_v18 = vadd.f32 %v5977_v53, %v7824_v58  ;;  %v1469_v3 = vpop.f32.mrb[9].mxu0  ;;  %6003 = vmatprep.mubr.f32.mxu0 %v1665_v37  ;;  %v1684_v14 = vsub.f32 %v7859_v16, %v8961_v41 }
 0x1a2   : > { %v7885_v28 = vand.u32 4294901760, %v1562_v6  ;;  %v1559_v42 = vsel %vm1539_vm1, %v1521_v50, 0  ;;  %v6916_v5 = vadd.f32 %v7824_v58, %v1469_v3  ;;  %6004 = vmatmul.mubr.f32.vlgmr.msra.gmra.mrb[16].mxu0 %v1675_v46  ;;  %v1694_v20 = vsub.f32 %v7856_v57, %v8956_v54 }
 0x1a3   : > { %v7892_v17 = vand.u32 4294901760, %v1559_v42  ;;  %v1524_v59 = vmax.f32 %v6915_v18, 0.0  ;;  %v1685_v19 = vand.u32 4294901760, %v1684_v14  ;;  %v8955_v11 = vand.u32 4294901760, %v7878_v1 }
 0x1a4   : > { %v7896_v12 = vsub.f32 %v1562_v6, %v7885_v28  ;;  %v1523_v13 = vmax.f32 %v6916_v5, 0.0  ;;  %v5980_v35 = vpop.f32.mrb[10].mxu0  ;;  %v1695_v37 = vand.u32 4294901760, %v1694_v20  ;;  %v8957_v50 = vand.u32 4294901760, %v7874_v47 }
 0x1a5   : > { %v7900_v46 = vsub.f32 %v1559_v42, %v7892_v17  ;;  %v1568_v53 = vsel %vm1539_vm1, %v1524_v59, 0  ;;  %v6917_v3 = vadd.f32 %v5980_v35, %v7824_v58  ;;  %v1481_v31 = vpop.f32.mrb[11].mxu0  ;;  %6006 = vmatprep.mubr.f32.mxu1 %v1685_v19  ;;  %v1704_v18 = vsub.f32 %v7878_v1, %v8955_v11 }
 0x1a6   : > { %v7907_v6 = vand.u32 4294901760, %v1568_v53  ;;  %v1565_v14 = vsel %vm1539_vm1, %v1523_v13, 0  ;;  %v6918_v5 = vadd.f32 %v7824_v58, %v1481_v31  ;;  %6007 = vmatmul.mubr.f32.vlgmr.msra.gmra.mrb[0].mxu1 %v1695_v37  ;;  %v1714_v42 = vsub.f32 %v7874_v47, %v8957_v50 }
 0x1a7   : > { %v7914_v20 = vand.u32 4294901760, %v1565_v14  ;;  %v1526_v59 = vmax.f32 %v6917_v3, 0.0  ;;  %6702 = vmatpush3.bf16.msra.mxu1 %v7764_v40  ;;  %v1705_v19 = vand.u32 4294901760, %v1704_v18  ;;  %v8959_v35 = vand.u32 4294901760, %v7900_v46 }
 0x1a8   : > { %v7919_v23 = vsub.f32 %v1568_v53, %v7907_v6  ;;  %v1525_v11 = vmax.f32 %v6918_v5, 0.0  ;;  %v5983_v13 = vpop.f32.mrb[12].mxu0  ;;  %v1715_v54 = vand.u32 4294901760, %v1714_v42  ;;  %6704 = vmatprep.subr.bf16.mxu1 %v7781_v25  ;;  %v8962_v31 = vand.u32 4294901760, %v7896_v12 }
 0x1a9   : > { %v7924_v37 = vsub.f32 %v1565_v14, %v7914_v20  ;;  %v1574_v3 = vsel %vm1539_vm1, %v1526_v59, 0  ;;  %v6919_v40 = vadd.f32 %v5983_v13, %v7824_v58  ;;  %v1493_v18 = vpop.f32.mrb[13].mxu0  ;;  %6009 = vmatprep.mubr.f32.mxu1 %v1705_v19  ;;  %v1724_v53 = vsub.f32 %v7900_v46, %v8959_v35 }
 0x1aa   : > { %v7931_v5 = vand.u32 4294901760, %v1574_v3  ;;  %v1571_v42 = vsel %vm1539_vm1, %v1525_v11, 0  ;;  %v6920_v50 = vadd.f32 %v7824_v58, %v1493_v18  ;;  %6010 = vmatmul.mubr.f32.gmra.mrb[2].mxu1 %v1715_v54  ;;  %v1734_v14 = vsub.f32 %v7896_v12, %v8962_v31 }
 0x1ab   : > { %v7938_v59 = vand.u32 4294901760, %v1571_v42  ;;  %v1528_v13 = vmax.f32 %v6919_v40, 0.0  ;;  %v1725_v22 = vand.u32 4294901760, %v1724_v53  ;;  %6706 = vmatpush3.bf16.msra.mxu1 %v7781_v25  ;;  %v8964_v19 = vand.u32 4294901760, %v7924_v37 }
 0x1ac   : > { %v7943_v35 = vsub.f32 %v1574_v3, %v7931_v5  ;;  %v1527_v21 = vmax.f32 %v6920_v50, 0.0  ;;  %v5986_v11 = vpop.f32.mrb[14].mxu0  ;;  %v1735_v41 = vand.u32 4294901760, %v1734_v14  ;;  %v8969_v54 = vand.u32 4294901760, %v7919_v23  ;;  %6708 = vmatprep.subr.bf16.mxu1 %v7795_v62 }
 0x1ad   : > { %v7948_v18 = vsub.f32 %v1571_v42, %v7938_v59  ;;  %v1580_v40 = vsel %vm1539_vm1, %v1528_v13, 0  ;;  %v6921_v53 = vadd.f32 %v5986_v11, %v7824_v58  ;;  %v1505_v25 = vpop.f32.mrb[15].mxu0  ;;  %6012 = vmatprep.mubr.f32.mxu1 %v1725_v22  ;;  %v1744_v3 = vsub.f32 %v7924_v37, %v8964_v19 }
 0x1ae   : > { %v7955_v50 = vand.u32 4294901760, %v1580_v40  ;;  %v1577_v14 = vsel %vm1539_vm1, %v1527_v21, 0  ;;  %v6922_v31 = vadd.f32 %v7824_v58, %v1505_v25  ;;  %6013 = vmatmul.mubr.f32.gmra.mrb[4].mxu1 %v1735_v41  ;;  %v1754_v42 = vsub.f32 %v7919_v23, %v8969_v54 }
 0x1af   : > { %v7962_v13 = vand.u32 4294901760, %v1577_v14  ;;  %v1530_v11 = vmax.f32 %v6921_v53, 0.0  ;;  %v1745_v26 = vand.u32 4294901760, %v1744_v3  ;;  %6710 = vmatpush3.bf16.msra.mxu1 %v7795_v62  ;;  %v8966_v22 = vand.u32 4294901760, %v7948_v18 }
 0x1b0   : > { %v7967_v19 = vsub.f32 %v1580_v40, %v7955_v50  ;;  %v1529_v49 = vmax.f32 %v6922_v31, 0.0  ;;  %v1755_v21 = vand.u32 4294901760, %v1754_v42  ;;  %v8967_v58 = vand.u32 4294901760, %v7943_v35  ;;  %6712 = vmatprep.subr.bf16.mxu1 %v7803_v27 }
 0x1b1   : > { %v7972_v41 = vsub.f32 %v1577_v14, %v7962_v13  ;;  %v1586_v25 = vsel %vm1539_vm1, %v1530_v11, 0  ;;  %6015 = vmatprep.mubr.f32.mxu1 %v1745_v26  ;;  %v1764_v62 = vsub.f32 %v7948_v18, %v8966_v22  ;;  %v8993_v29 = vand.u32 4294901760, %v7878_v1 }
 0x1b2   : > { %v7978_v53 = vand.u32 4294901760, %v1586_v25  ;;  %v1583_v40 = vsel %vm1539_vm1, %v1529_v49, 0  ;;  %6016 = vmatmul.mubr.f32.gmra.mrb[6].mxu1 %v1755_v21  ;;  %v1774_v31 = vsub.f32 %v7943_v35, %v8967_v58  ;;  %v8968_v3 = vand.u32 4294901760, %v7967_v19 }
 0x1b3   : > { %v7985_v14 = vand.u32 4294901760, %v1583_v40  ;;  %v1765_v42 = vand.u32 4294901760, %v1764_v62  ;;  %v1783_v26 = vand.u32 4294901760, %v7972_v41  ;;  %6714 = vmatpush3.bf16.msra.mxu1 %v7803_v27  ;;  %v9000_v38 = vand.u32 4294901760, %v7919_v23 }
 0x1b4   : > { %v7990_v11 = vsub.f32 %v1586_v25, %v7978_v53  ;;  %v1775_v22 = vand.u32 4294901760, %v1774_v31  ;;  %v1794_v49 = vsub.f32 %v7967_v19, %v8968_v3  ;;  %6716 = vmatprep.subr.bf16.mxu1 %v7807_v9  ;;  %v9001_v39 = vand.u32 4294901760, %v7948_v18 }
 0x1b5   : > { %v7997_v21 = vsub.f32 %v1583_v40, %v7985_v14  ;;  %6018 = vmatprep.mubr.f32.mxu1 %v1765_v42  ;;  %v1784_v62 = vsub.f32 %v7972_v41, %v1783_v26 }
 0x1b6   : > { %6019 = vmatmul.mubr.f32.gmra.mrb[8].mxu1 %v1775_v22  ;;  %v1813_v27 = vand.u32 4294901760, %v7990_v11  ;;  %v1795_v58 = vand.u32 4294901760, %v1794_v49 }
 0x1b7   : > { %v1785_v25 = vand.u32 4294901760, %v1784_v62  ;;  %v1803_v31 = vand.u32 4294901760, %v7997_v21 }
 0x1b8   : > { %v1814_v3 = vsub.f32 %v7990_v11, %v1813_v27 }
 0x1b9   : > { %6021 = vmatprep.mubr.f32.mxu1 %v1785_v25  ;;  %v1804_v40 = vsub.f32 %v7997_v21, %v1803_v31 }
 0x1ba   : > { %6022 = vmatmul.mubr.f32.gmra.mrb[10].mxu1 %v1795_v58  ;;  %v1815_v54 = vand.u32 4294901760, %v1814_v3 }
 0x1bb   : > { %v1805_v42 = vand.u32 4294901760, %v1804_v40 }
 0x1bd   : > { %6024 = vmatprep.mubr.f32.mxu1 %v1805_v42 }
 0x1be   : > { %6025 = vmatmul.mubr.f32.gmra.mrb[12].mxu1 %v1815_v54 }
 0x1bf   : > { %6043 = vmatprep.mubr.f32.mxu1 %v7834_v48 }
 0x1c2   : > { %6044 = vmatmul.mubr.f32.vlgmr.msra.gmra.mrb[14].mxu1 %v7830_v43 }
 0x1c3   : > { %6718 = vmatpush3.bf16.msra.mxu1 %v7807_v9  ;;  %6046 = vmatprep.mubr.f32.mxu1 %v7849_v15  ;;  %v6747_v9 = vpack.c.bf16 %v1831_v0, %v1824_v63  ;;  %v8988_v63 = vand.u32 4294901760, %v7837_v52  ;;  %v8989_v0 = vand.u32 4294901760, %v7859_v16 }
 0x1c4   : > { %6720 = vmatprep.subr.bf16.mxu1 %v7811_v34 }
 0x1c6   : > { %6047 = vmatmul.mubr.f32.gmra.mrb[0].mxu1 %v7845_v2 }
 0x1c7   : > { %6049 = vmatprep.mubr.f32.mxu1 %v7870_v24  ;;  %6722 = vmatpush3.bf16.msra.mxu1 %v7811_v34  ;;  %v8990_v34 = vand.u32 4294901760, %v7775_v4  ;;  %v8997_v4 = vand.u32 4294901760, %v7900_v46 }
 0x1c8   : > { %6724 = vmatprep.subr.bf16.mxu1 %v7815_v36 }
 0x1ca   : > { %6050 = vmatmul.mubr.f32.gmra.mrb[2].mxu1 %v7866_v8 }
 0x1cb   : > { %6052 = vmatprep.mubr.f32.mxu1 %v7892_v17  ;;  %6726 = vmatpush3.bf16.msra.mxu1 %v7815_v36  ;;  %v8991_v36 = vand.u32 4294901760, %v7777_v7  ;;  %v8998_v7 = vand.u32 4294901760, %v7896_v12 }
 0x1cc   : > { %6728 = vmatprep.subr.bf16.mxu1 %v7819_v10 }
 0x1ce   : > { %6053 = vmatmul.mubr.f32.gmra.mrb[4].mxu1 %v7885_v28 }
 0x1cf   : > { %6055 = vmatprep.mubr.f32.mxu1 %v7914_v20  ;;  %6730 = vmatpush3.bf16.msra.mxu1 %v7819_v10  ;;  %v6755_v10 = vpack.c.bf16 %v8991_v36, %v8990_v34 }
 0x1d0   : > { %6732 = vmatprep.subr.bf16.mxu1 %v7706_v32 }
 0x1d2   : > { %6056 = vmatmul.mubr.f32.gmra.mrb[6].mxu1 %v7907_v6 }
 0x1d3   : > { %6058 = vmatprep.mubr.f32.mxu1 %v7938_v59 }
 0x1d6   : > { %6059 = vmatmul.mubr.f32.gmra.mrb[8].mxu1 %v7931_v5 }
 0x1d7   : > { %6061 = vmatprep.mubr.f32.mxu1 %v7962_v13 }
 0x1da   : > { %6062 = vmatmul.mubr.f32.gmra.mrb[10].mxu1 %v7955_v50 }
 0x1db   : > { %6064 = vmatprep.mubr.f32.mxu1 %v7985_v14 }
 0x1de   : > { %6065 = vmatmul.mubr.f32.gmra.mrb[12].mxu1 %v7978_v53 }
 0x1df   : > { %6083 = vmatprep.mubr.f32.mxu1 %v7840_v55  ;;  %v8992_v55 = vand.u32 4294901760, %v7856_v57 }
 0x1e2   : > { %6084 = vmatmul.mubr.f32.vlgmr.msra.gmra.mrb[14].mxu1 %v7837_v52  ;;  %v6759_v52 = vpack.c.bf16 %v8995_v45, %v8994_v30 }
 0x1e3   : > { %6734 = vmatpush3.bf16.msra.mxu1 %v7706_v32  ;;  %6086 = vmatprep.mubr.f32.mxu1 %v7859_v16  ;;  %v9002_v16 = vand.u32 4294901760, %v7943_v35 }
 0x1e4   : > { %6736 = vmatprep.subr.bf16.mxu1 %v7718_v44 }
 0x1e6   : > { %6087 = vmatmul.mubr.f32.gmra.mrb[0].mxu1 %v7856_v57  ;;  %v8999_v57 = vand.u32 4294901760, %v7924_v37 }
 0x1e7   : > { %6089 = vmatprep.mubr.f32.mxu1 %v7878_v1  ;;  %6738 = vmatpush3.bf16.msra.mxu1 %v7718_v44 }
 0x1e8   : > { %6740 = vmatprep.subr.bf16.mxu1 %v7730_v51 }
 0x1ea   : > { %6090 = vmatmul.mubr.f32.gmra.mrb[2].mxu1 %v7874_v47 }
 0x1eb   : > { %6092 = vmatprep.mubr.f32.mxu1 %v7900_v46  ;;  %6742 = vmatpush3.bf16.msra.mxu1 %v7730_v51 }
 0x1ec   : > { %6744 = vmatprep.subr.bf16.mxu1 %v7742_v56 }
 0x1ee   : > { %6093 = vmatmul.mubr.f32.gmra.mrb[4].mxu1 %v7896_v12 }
 0x1ef   : > { %6095 = vmatprep.mubr.f32.mxu1 %v7924_v37  ;;  %6746 = vmatpush3.bf16.msra.mxu1 %v7742_v56 }
 0x1f0   : > { %6748 = vmatprep.subr.bf16.mxu1 %v6747_v9 }
 0x1f2   : > { %6096 = vmatmul.mubr.f32.gmra.mrb[6].mxu1 %v7919_v23 }
 0x1f3   : > { %6098 = vmatprep.mubr.f32.mxu1 %v7948_v18 }
 0x1f6   : > { %6099 = vmatmul.mubr.f32.gmra.mrb[8].mxu1 %v7943_v35 }
 0x1f7   : > { %6101 = vmatprep.mubr.f32.mxu1 %v7972_v41 }
 0x1fa   : > { %6102 = vmatmul.mubr.f32.gmra.mrb[10].mxu1 %v7967_v19 }
 0x1fb   : > { %6104 = vmatprep.mubr.f32.mxu1 %v7997_v21 }
 0x1fe   : > { %6105 = vmatmul.mubr.f32.gmra.mrb[12].mxu1 %v7990_v11 }
 0x1ff   : > { %6123 = vmatprep.mubr.f32.mxu1 %v1663_v33  ;;  %v8996_v33 = vand.u32 4294901760, %v7874_v47  ;;  %v9003_v47 = vand.u32 4294901760, %v7967_v19 }
 0x202   : > { %6124 = vmatmul.mubr.f32.vlgmr.msra.gmra.mrb[14].mxu1 %v8988_v63 }
 0x203   : > { %6750 = vmatpush3.bf16.msra.mxu1 %v6747_v9  ;;  %6126 = vmatprep.mubr.f32.mxu1 %v8989_v0 }
 0x204   : > { %6752 = vmatprep.subr.bf16.mxu1 %v6751_v61 }
 0x206   : > { %6127 = vmatmul.mubr.f32.gmra.mrb[0].mxu1 %v8992_v55 }
 0x207   : > { %6129 = vmatprep.mubr.f32.mxu1 %v8993_v29  ;;  %6754 = vmatpush3.bf16.msra.mxu1 %v6751_v61 }
 0x208   : > { %6756 = vmatprep.subr.bf16.mxu1 %v6755_v10 }
 0x20a   : > { %6130 = vmatmul.mubr.f32.gmra.mrb[2].mxu1 %v8996_v33 }
 0x20b   : > { %6132 = vmatprep.mubr.f32.mxu1 %v8997_v4  ;;  %6758 = vmatpush3.bf16.msra.mxu1 %v6755_v10 }
 0x20c   : > { %6760 = vmatprep.subr.bf16.mxu1 %v6759_v52 }
 0x20e   : > { %6133 = vmatmul.mubr.f32.gmra.mrb[4].mxu1 %v8998_v7 }
 0x20f   : > { %6135 = vmatprep.mubr.f32.mxu1 %v8999_v57  ;;  %6762 = vmatpush3.bf16.msra.mxu1 %v6759_v52 }
 0x210   : > { %6764 = vmatprep.subr.bf16.mxu1 %v7706_v32 }
 0x212   : > { %6136 = vmatmul.mubr.f32.gmra.mrb[6].mxu1 %v9000_v38 }
 0x213   : > { %6138 = vmatprep.mubr.f32.mxu1 %v9001_v39 }
 0x216   : > { %6139 = vmatmul.mubr.f32.gmra.mrb[8].mxu1 %v9002_v16 }
 0x217   : > { %6141 = vmatprep.mubr.f32.mxu1 %v1783_v26 }
 0x21a   : > { %6142 = vmatmul.mubr.f32.gmra.mrb[10].mxu1 %v9003_v47 }
 0x21b   : > { %6144 = vmatprep.mubr.f32.mxu1 %v1803_v31 }
 0x21e   : > { %6145 = vmatmul.mubr.f32.gmra.mrb[12].mxu1 %v1813_v27 }
 0x21f   : > { %6163 = vmatprep.mubr.f32.mxu1 %v7834_v48 }
 0x222   : > { %6164 = vmatmul.mubr.f32.vlgmr.msra.gmra.mrb[14].mxu1 %v7830_v43 }
 0x223   : > { %6766 = vmatpush3.bf16.msra.mxu1 %v7706_v32  ;;  %6166 = vmatprep.mubr.f32.mxu1 %v7849_v15 }
 0x224   : > { %6768 = vmatprep.subr.bf16.mxu1 %v7718_v44 }
 0x226   : > { %6167 = vmatmul.mubr.f32.gmra.mrb[0].mxu1 %v7845_v2 }
 0x227   : > { %6169 = vmatprep.mubr.f32.mxu1 %v7870_v24  ;;  %6770 = vmatpush3.bf16.msra.mxu1 %v7718_v44 }
 0x228   : > { %6772 = vmatprep.subr.bf16.mxu1 %v7730_v51 }
 0x22a   : > { %6170 = vmatmul.mubr.f32.gmra.mrb[2].mxu1 %v7866_v8 }
 0x22b   : > { %6172 = vmatprep.mubr.f32.mxu1 %v7892_v17  ;;  %6774 = vmatpush3.bf16.msra.mxu1 %v7730_v51  ;;  %v2770_v51 = vld [vmem:[%s8947_s4] sm:$0xff] }
 0x22c   : > { %6776 = vmatprep.subr.bf16.mxu1 %v7742_v56  ;;  %v2829_v23 = vand.u32 4294901760, %v2770_v51 }
 0x22e   : > { %6173 = vmatmul.mubr.f32.gmra.mrb[4].mxu1 %v7885_v28 }
 0x22f   : > { %6175 = vmatprep.mubr.f32.mxu1 %v7914_v20  ;;  %6778 = vmatpush3.bf16.msra.mxu1 %v7742_v56  ;;  %v2771_v56 = vld [vmem:[%s8947_s4 + $0x8] sm:$0xff] }
 0x232   : > { %6176 = vmatmul.mubr.f32.gmra.mrb[6].mxu1 %v7907_v6 }
 0x233   : > { %6178 = vmatprep.mubr.f32.mxu1 %v7938_v59 }
 0x236   : > { %6179 = vmatmul.mubr.f32.gmra.mrb[8].mxu1 %v7931_v5 }
 0x237   : > { %6181 = vmatprep.mubr.f32.mxu1 %v7962_v13 }
 0x23a   : > { %6182 = vmatmul.mubr.f32.gmra.mrb[10].mxu1 %v7955_v50 }
 0x23b   : > { %6184 = vmatprep.mubr.f32.mxu1 %v7985_v14 }
 0x23e   : > { %6185 = vmatmul.mubr.f32.gmra.mrb[12].mxu1 %v7978_v53 }
 0x23f   : > { %6203 = vmatprep.mubr.f32.mxu1 %v7834_v48 }
 0x242   : > { %6204 = vmatmul.mubr.f32.vlgmr.msra.gmra.mrb[14].mxu1 %v7830_v43  ;;  %v2832_v43 = vand.u32 4294901760, %v2771_v56 }
 0x243   : > { %6206 = vmatprep.mubr.f32.mxu1 %v7849_v15 }
 0x244   : > { %v8151_v48 = vpack.c.bf16 %v2832_v43, %v2829_v23  ;;  %v8157_v15 = vsub.f32 %v2771_v56, %v2832_v43 }
 0x246   : > { %6207 = vmatmul.mubr.f32.gmra.mrb[0].mxu1 %v7845_v2  ;;  %6780 = vmatprep.subr.bf16.mxu0 %v8151_v48  ;;  %v8155_v2 = vsub.f32 %v2770_v51, %v2829_v23 }
 0x247   : > { %6209 = vmatprep.mubr.f32.mxu1 %v7870_v24  ;;  %6782 = vmatpush3.bf16.msra.mxu0 %v8151_v48  ;;  %v3065_v24 = vand.u32 4294901760, %v8157_v15 }
 0x24a   : > { %6210 = vmatmul.mubr.f32.gmra.mrb[2].mxu1 %v7866_v8  ;;  %v3058_v8 = vand.u32 4294901760, %v8155_v2 }
 0x24b   : > { %6212 = vmatprep.mubr.f32.mxu1 %v7892_v17 }
 0x24c   : > { %v3059_v1 = vsub.f32 %v8155_v2, %v3058_v8 }
 0x24e   : > { %6213 = vmatmul.mubr.f32.gmra.mrb[4].mxu1 %v7885_v28  ;;  %v3066_v28 = vsub.f32 %v8157_v15, %v3065_v24  ;;  %v3060_v17 = vand.u32 4294901760, %v3059_v1 }
 0x24f   : > { %6215 = vmatprep.mubr.f32.mxu1 %v7914_v20 }
 0x250   : > { %v3067_v12 = vand.u32 4294901760, %v3066_v28 }
 0x252   : > { %6216 = vmatmul.mubr.f32.gmra.mrb[6].mxu1 %v7907_v6  ;;  %v6783_v46 = vpack.c.bf16 %v3067_v12, %v3060_v17  ;;  %v8169_v6 = vpack.c.bf16 %v8157_v15, %v8155_v2  ;;  %v3953_v2 = vld [vmem:[%s8949_s6 + $0x28] sm:$0xff] }
 0x253   : > { %6218 = vmatprep.mubr.f32.mxu1 %v7938_v59 }
 0x254   : > { %6784 = vmatprep.subr.bf16.mxu0 %v6783_v46 }
 0x256   : > { %6219 = vmatmul.mubr.f32.gmra.mrb[8].mxu1 %v7931_v5 }
 0x257   : > { %6221 = vmatprep.mubr.f32.mxu1 %v7962_v13 }
 0x25a   : > { %6222 = vmatmul.mubr.f32.gmra.mrb[10].mxu1 %v7955_v50 }
 0x25b   : > { %6224 = vmatprep.mubr.f32.mxu1 %v7985_v14 }
 0x25e   : > { %6225 = vmatmul.mubr.f32.gmra.mrb[12].mxu1 %v7978_v53 }
 0x275   : > { %v6005_v32 = vpop.f32.mrb[16].mxu0 }
 0x276   : > { %v1667_v44 = vpop.f32.mrb[17].mxu0 }
 0x315   : > { %v6205_v20 = vpop.f32.mrb[14].mxu1 }
 0x316   : > { %v6923_v35 = vadd.f32 %v6205_v20, %v6005_v32  ;;  %v2676_v37 = vpop.f32.mrb[15].mxu1 }
 0x317   : > { %v6924_v5 = vadd.f32 %v2676_v37, %v1667_v44 }
 0x318   : > { %v2784_v59 = vsel %vm2779_vm2, %v6923_v35, 0 }
 0x319   : > { %v8172_v19 = vand.u32 4294901760, %v2784_v59  ;;  %v2781_v54 = vsel %vm2779_vm2, %v6924_v5, 0  ;;  %v6208_v18 = vpop.f32.mrb[0].mxu1 }
 0x31a   : > { %v8175_v50 = vand.u32 4294901760, %v2781_v54  ;;  %v2790_v13 = vsel %vm2779_vm2, %v6208_v18, 0  ;;  %v2688_v22 = vpop.f32.mrb[1].mxu1 }
 0x31b   : > { %v8179_v58 = vsub.f32 %v2784_v59, %v8172_v19  ;;  %v8181_v41 = vand.u32 4294901760, %v2790_v13  ;;  %v2787_v53 = vsel %vm2779_vm2, %v2688_v22, 0 }
 0x31c   : > { %v8185_v3 = vsub.f32 %v2781_v54, %v8175_v50  ;;  %v8187_v14 = vand.u32 4294901760, %v2787_v53 }
 0x31d   : > { %v2907_v26 = vand.u32 4294901760, %v8179_v58  ;;  %v8191_v11 = vsub.f32 %v2790_v13, %v8181_v41  ;;  %v6211_v49 = vpop.f32.mrb[2].mxu1 }
 0x31e   : > { %v8194_v21 = vsub.f32 %v2787_v53, %v8187_v14  ;;  %v2796_v62 = vsel %vm2779_vm2, %v6211_v49, 0  ;;  %v2700_v27 = vpop.f32.mrb[3].mxu1  ;;  %v2897_v25 = vand.u32 4294901760, %v8185_v3 }
 0x31f   : > { %v2927_v31 = vand.u32 4294901760, %v8191_v11  ;;  %v8199_v40 = vand.u32 4294901760, %v2796_v62  ;;  %v2793_v42 = vsel %vm2779_vm2, %v2700_v27, 0  ;;  %v2908_v9 = vsub.f32 %v8179_v58, %v2907_v26 }
 0x320   : > { %v2917_v60 = vand.u32 4294901760, %v8194_v21  ;;  %v8206_v61 = vand.u32 4294901760, %v2793_v42  ;;  %v2898_v63 = vsub.f32 %v8185_v3, %v2897_v25 }
 0x321   : > { %v8212_v0 = vsub.f32 %v2796_v62, %v8199_v40  ;;  %v6214_v34 = vpop.f32.mrb[4].mxu1  ;;  %v2909_v36 = vand.u32 4294901760, %v2908_v9  ;;  %v2928_v7 = vsub.f32 %v8191_v11, %v2927_v31 }
 0x322   : > { %v8215_v10 = vsub.f32 %v2793_v42, %v8206_v61  ;;  %v2802_v55 = vsel %vm2779_vm2, %v6214_v34, 0  ;;  %v2712_v29 = vpop.f32.mrb[5].mxu1  ;;  %v2899_v30 = vand.u32 4294901760, %v2898_v63  ;;  %v2918_v45 = vsub.f32 %v8194_v21, %v2917_v60 }
 0x323   : > { %v2947_v52 = vand.u32 4294901760, %v8212_v0  ;;  %v8222_v33 = vand.u32 4294901760, %v2802_v55  ;;  %v2799_v4 = vsel %vm2779_vm2, %v2712_v29, 0  ;;  %v2929_v17 = vand.u32 4294901760, %v2928_v7 }
 0x324   : > { %v2937_v57 = vand.u32 4294901760, %v8215_v10  ;;  %v8229_v38 = vand.u32 4294901760, %v2799_v4  ;;  %6231 = vmatprep.mubr.f32.mxu0 %v2899_v30  ;;  %v2919_v39 = vand.u32 4294901760, %v2918_v45 }
 0x325   : > { %v8232_v16 = vsub.f32 %v2802_v55, %v8222_v33  ;;  %v6217_v47 = vpop.f32.mrb[6].mxu1  ;;  %6232 = vmatmul.mubr.f32.vlgmr.msra.gmra.mrb[18].mxu0 %v2909_v36  ;;  %v2948_v23 = vsub.f32 %v8212_v0, %v2947_v52 }
 0x326   : > { %v8235_v32 = vsub.f32 %v2799_v4, %v8229_v38  ;;  %v2808_v44 = vsel %vm2779_vm2, %v6217_v47, 0  ;;  %6786 = vmatpush3.bf16.msra.mxu0 %v6783_v46  ;;  %v2724_v51 = vpop.f32.mrb[7].mxu1  ;;  %6234 = vmatprep.mubr.f32.mxu0 %v2919_v39  ;;  %v2938_v56 = vsub.f32 %v8215_v10, %v2937_v57 }
 0x327   : > { %v2967_v43 = vand.u32 4294901760, %v8232_v16  ;;  %v8245_v1 = vand.u32 4294901760, %v2808_v44  ;;  %v2805_v28 = vsel %vm2779_vm2, %v2724_v51, 0  ;;  %6788 = vmatprep.subr.bf16.mxu0 %v8169_v6  ;;  %v2949_v18 = vand.u32 4294901760, %v2948_v23 }
 0x328   : > { %v2957_v12 = vand.u32 4294901760, %v8235_v32  ;;  %v8250_v46 = vand.u32 4294901760, %v2805_v28  ;;  %v2939_v20 = vand.u32 4294901760, %v2938_v56 }
 0x329   : > { %v8253_v35 = vsub.f32 %v2808_v44, %v8245_v1  ;;  %v6220_v37 = vpop.f32.mrb[8].mxu1  ;;  %6235 = vmatmul.mubr.f32.gmra.mrb[20].mxu0 %v2929_v17  ;;  %v2968_v62 = vsub.f32 %v8232_v16, %v2967_v43 }
 0x32a   : > { %v8256_v5 = vsub.f32 %v2805_v28, %v8250_v46  ;;  %v2814_v59 = vsel %vm2779_vm2, %v6220_v37, 0  ;;  %v2736_v54 = vpop.f32.mrb[9].mxu1  ;;  %6237 = vmatprep.mubr.f32.mxu0 %v2939_v20  ;;  %v2958_v13 = vsub.f32 %v8235_v32, %v2957_v12 }
 0x32b   : > { %v2987_v22 = vand.u32 4294901760, %v8253_v35  ;;  %v8263_v53 = vand.u32 4294901760, %v2814_v59  ;;  %v2811_v49 = vsel %vm2779_vm2, %v2736_v54, 0  ;;  %v2969_v47 = vand.u32 4294901760, %v2968_v62 }
 0x32c   : > { %v2977_v27 = vand.u32 4294901760, %v8256_v5  ;;  %v8270_v42 = vand.u32 4294901760, %v2811_v49  ;;  %v2959_v9 = vand.u32 4294901760, %v2958_v13 }
 0x32d   : > { %v8273_v63 = vsub.f32 %v2814_v59, %v8263_v53  ;;  %v6223_v34 = vpop.f32.mrb[10].mxu1  ;;  %6238 = vmatmul.mubr.f32.gmra.mrb[22].mxu0 %v2949_v18  ;;  %v2988_v45 = vsub.f32 %v8253_v35, %v2987_v22 }
 0x32e   : > { %v8276_v36 = vsub.f32 %v2811_v49, %v8270_v42  ;;  %v2820_v55 = vsel %vm2779_vm2, %v6223_v34, 0  ;;  %v2748_v29 = vpop.f32.mrb[11].mxu1  ;;  %6240 = vmatprep.mubr.f32.mxu0 %v2959_v9  ;;  %v2978_v30 = vsub.f32 %v8256_v5, %v2977_v27 }
 0x32f   : > { %v3007_v4 = vand.u32 4294901760, %v8273_v63  ;;  %v8286_v7 = vand.u32 4294901760, %v2820_v55  ;;  %v2817_v39 = vsel %vm2779_vm2, %v2748_v29, 0  ;;  %v2989_v59 = vand.u32 4294901760, %v2988_v45 }
 0x330   : > { %v2997_v44 = vand.u32 4294901760, %v8276_v36  ;;  %v8290_v51 = vand.u32 4294901760, %v2817_v39  ;;  %v2979_v56 = vand.u32 4294901760, %v2978_v30 }
 0x331   : > { %v8293_v23 = vsub.f32 %v2820_v55, %v8286_v7  ;;  %v6226_v28 = vpop.f32.mrb[12].mxu1  ;;  %6241 = vmatmul.mubr.f32.gmra.mrb[24].mxu0 %v2969_v47  ;;  %v3008_v62 = vsub.f32 %v8273_v63, %v3007_v4 }
 0x332   : > { %v8296_v17 = vsub.f32 %v2817_v39, %v8290_v51  ;;  %v2826_v20 = vsel %vm2779_vm2, %v6226_v28, 0  ;;  %v2760_v37 = vpop.f32.mrb[13].mxu1  ;;  %6243 = vmatprep.mubr.f32.mxu0 %v2979_v56  ;;  %v2998_v54 = vsub.f32 %v8276_v36, %v2997_v44 }
 0x333   : > { %v3027_v18 = vand.u32 4294901760, %v8293_v23  ;;  %v8303_v13 = vand.u32 4294901760, %v2826_v20  ;;  %v2823_v49 = vsel %vm2779_vm2, %v2760_v37, 0  ;;  %v3009_v47 = vand.u32 4294901760, %v3008_v62 }
 0x334   : > { %v3017_v9 = vand.u32 4294901760, %v8296_v17  ;;  %v8310_v34 = vand.u32 4294901760, %v2823_v49  ;;  %v2999_v55 = vand.u32 4294901760, %v2998_v54 }
 0x335   : > { %v8313_v29 = vsub.f32 %v2826_v20, %v8303_v13  ;;  %6244 = vmatmul.mubr.f32.gmra.mrb[26].mxu0 %v2989_v59  ;;  %v3028_v56 = vsub.f32 %v8293_v23, %v3027_v18 }
 0x336   : > { %v8316_v30 = vsub.f32 %v2823_v49, %v8310_v34  ;;  %6246 = vmatprep.mubr.f32.mxu0 %v2999_v55  ;;  %v3018_v45 = vsub.f32 %v8296_v17, %v3017_v9  ;;  %v8358_v55 = vld [vmem:[%s8949_s6 + $0x8] sm:$0xff] }
 0x337   : > { %v3047_v39 = vand.u32 4294901760, %v8313_v29  ;;  %v3029_v59 = vand.u32 4294901760, %v3028_v56  ;;  %v4015_v56 = vand.u32 4294901760, %v8358_v55 }
 0x338   : > { %v3037_v28 = vand.u32 4294901760, %v8316_v30  ;;  %v3019_v20 = vand.u32 4294901760, %v3018_v45  ;;  %v8363_v45 = vld [vmem:[%s8949_s6 + $0x10] sm:$0xff] }
 0x339   : > { %6247 = vmatmul.mubr.f32.gmra.mrb[28].mxu0 %v3009_v47  ;;  %v3048_v54 = vsub.f32 %v8313_v29, %v3047_v39 }
 0x33a   : > { %6249 = vmatprep.mubr.f32.mxu0 %v3019_v20  ;;  %v3038_v37 = vsub.f32 %v8316_v30, %v3037_v28  ;;  %v8371_v20 = vld [vmem:[%s8949_s6 + $0x18] sm:$0xff] }
 0x33b   : > { %v3049_v62 = vand.u32 4294901760, %v3048_v54  ;;  %v4021_v54 = vand.u32 4294901760, %v8371_v20 }
 0x33c   : > { %v3039_v49 = vand.u32 4294901760, %v3038_v37  ;;  %v4018_v37 = vand.u32 4294901760, %v8363_v45 }
 0x33d   : > { %6250 = vmatmul.mubr.f32.gmra.mrb[30].mxu0 %v3029_v59  ;;  %v6795_v59 = vpack.c.bf16 %v3065_v24, %v3058_v8  ;;  %v4027_v8 = vand.u32 4294901760, %v3953_v2 }
 0x33e   : > { %6252 = vmatprep.mubr.f32.mxu0 %v3039_v49 }
 0x341   : > { %6253 = vmatmul.mubr.f32.gmra.mrb[32].mxu0 %v3049_v62  ;;  %v8390_v62 = vpack.c.bf16 %v4021_v54, %v4018_v37 }
 0x342   : > { %6259 = vmatprep.mubr.f32.mxu0 %v8175_v50 }
 0x345   : > { %6260 = vmatmul.mubr.f32.vlgmr.msra.gmra.mrb[18].mxu0 %v8172_v19 }
 0x346   : > { %6790 = vmatpush3.bf16.msra.mxu0 %v8169_v6  ;;  %6262 = vmatprep.mubr.f32.mxu0 %v8187_v14  ;;  %v8353_v6 = vld [vmem:[%s8949_s6] sm:$0xff] }
 0x347   : > { %6792 = vmatprep.subr.bf16.mxu0 %v8151_v48  ;;  %v4012_v47 = vand.u32 4294901760, %v8353_v6 }
 0x349   : > { %6263 = vmatmul.mubr.f32.gmra.mrb[20].mxu0 %v8181_v41  ;;  %v8383_v49 = vpack.c.bf16 %v4015_v56, %v4012_v47 }
 0x34a   : > { %6265 = vmatprep.mubr.f32.mxu0 %v8206_v61 }
 0x34b   : > { %6804 = vmatprep.subr.bf16.mxu1 %v8383_v49 }
 0x34c   : > { %6806 = vmatpush3.bf16.msra.mxu1 %v8383_v49 }
 0x34d   : > { %6266 = vmatmul.mubr.f32.gmra.mrb[22].mxu0 %v8199_v40  ;;  %6808 = vmatprep.subr.bf16.mxu1 %v8390_v62 }
 0x34e   : > { %6268 = vmatprep.mubr.f32.mxu0 %v8229_v38 }
 0x350   : > { %6810 = vmatpush3.bf16.msra.mxu1 %v8390_v62 }
 0x351   : > { %6269 = vmatmul.mubr.f32.gmra.mrb[24].mxu0 %v8222_v33 }
 0x352   : > { %6271 = vmatprep.mubr.f32.mxu0 %v8250_v46 }
 0x355   : > { %6272 = vmatmul.mubr.f32.gmra.mrb[26].mxu0 %v8245_v1 }
 0x356   : > { %6274 = vmatprep.mubr.f32.mxu0 %v8270_v42 }
 0x359   : > { %6275 = vmatmul.mubr.f32.gmra.mrb[28].mxu0 %v8263_v53 }
 0x35a   : > { %6277 = vmatprep.mubr.f32.mxu0 %v8290_v51 }
 0x35d   : > { %6278 = vmatmul.mubr.f32.gmra.mrb[30].mxu0 %v8286_v7 }
 0x35e   : > { %6280 = vmatprep.mubr.f32.mxu0 %v8310_v34 }
 0x361   : > { %6281 = vmatmul.mubr.f32.gmra.mrb[32].mxu0 %v8303_v13 }
 0x362   : > { %6287 = vmatprep.mubr.f32.mxu0 %v8185_v3 }
 0x365   : > { %6288 = vmatmul.mubr.f32.vlgmr.msra.gmra.mrb[18].mxu0 %v8179_v58 }
 0x366   : > { %6794 = vmatpush3.bf16.msra.mxu0 %v8151_v48  ;;  %6290 = vmatprep.mubr.f32.mxu0 %v8194_v21 }
 0x367   : > { %6796 = vmatprep.subr.bf16.mxu0 %v6795_v59 }
 0x369   : > { %6291 = vmatmul.mubr.f32.gmra.mrb[20].mxu0 %v8191_v11 }
 0x36a   : > { %6293 = vmatprep.mubr.f32.mxu0 %v8215_v10  ;;  %v8519_v10 = vsub.f32 %v3953_v2, %v4027_v8 }
 0x36d   : > { %6294 = vmatmul.mubr.f32.gmra.mrb[22].mxu0 %v8212_v0 }
 0x36e   : > { %6296 = vmatprep.mubr.f32.mxu0 %v8235_v32 }
 0x371   : > { %6297 = vmatmul.mubr.f32.gmra.mrb[24].mxu0 %v8232_v16 }
 0x372   : > { %6299 = vmatprep.mubr.f32.mxu0 %v8256_v5 }
 0x375   : > { %6300 = vmatmul.mubr.f32.gmra.mrb[26].mxu0 %v8253_v35 }
 0x376   : > { %6302 = vmatprep.mubr.f32.mxu0 %v8276_v36 }
 0x379   : > { %6303 = vmatmul.mubr.f32.gmra.mrb[28].mxu0 %v8273_v63 }
 0x37a   : > { %6305 = vmatprep.mubr.f32.mxu0 %v8296_v17 }
 0x37d   : > { %6306 = vmatmul.mubr.f32.gmra.mrb[30].mxu0 %v8293_v23 }
 0x37e   : > { %6308 = vmatprep.mubr.f32.mxu0 %v8316_v30 }
 0x381   : > { %6309 = vmatmul.mubr.f32.gmra.mrb[32].mxu0 %v8313_v29 }
 0x382   : > { %6315 = vmatprep.mubr.f32.mxu0 %v2897_v25 }
 0x385   : > { %6316 = vmatmul.mubr.f32.vlgmr.msra.gmra.mrb[18].mxu0 %v2907_v26  ;;  %v8505_v26 = vsub.f32 %v8358_v55, %v4015_v56 }
 0x386   : > { %6798 = vmatpush3.bf16.msra.mxu0 %v6795_v59  ;;  %6318 = vmatprep.mubr.f32.mxu0 %v2917_v60 }
 0x387   : > { %6800 = vmatprep.subr.bf16.mxu0 %v8151_v48  ;;  %v4254_v21 = vand.u32 4294901760, %v8505_v26 }
 0x389   : > { %6319 = vmatmul.mubr.f32.gmra.mrb[20].mxu0 %v2927_v31  ;;  %v4255_v31 = vsub.f32 %v8505_v26, %v4254_v21 }
 0x38a   : > { %6321 = vmatprep.mubr.f32.mxu0 %v2937_v57 }
 0x38b   : > { %v4256_v60 = vand.u32 4294901760, %v4255_v31 }
 0x38d   : > { %6322 = vmatmul.mubr.f32.gmra.mrb[22].mxu0 %v2947_v52 }
 0x38e   : > { %6324 = vmatprep.mubr.f32.mxu0 %v2957_v12 }
 0x391   : > { %6325 = vmatmul.mubr.f32.gmra.mrb[24].mxu0 %v2967_v43 }
 0x392   : > { %6327 = vmatprep.mubr.f32.mxu0 %v2977_v27 }
 0x395   : > { %6328 = vmatmul.mubr.f32.gmra.mrb[26].mxu0 %v2987_v22 }
 0x396   : > { %6330 = vmatprep.mubr.f32.mxu0 %v2997_v44  ;;  %v8566_v44 = vsub.f32 %v8371_v20, %v4021_v54 }
 0x399   : > { %6331 = vmatmul.mubr.f32.gmra.mrb[28].mxu0 %v3007_v4 }
 0x39a   : > { %6333 = vmatprep.mubr.f32.mxu0 %v3017_v9  ;;  %v4268_v9 = vand.u32 4294901760, %v8566_v44 }
 0x39d   : > { %6334 = vmatmul.mubr.f32.gmra.mrb[30].mxu0 %v3027_v18 }
 0x39e   : > { %6336 = vmatprep.mubr.f32.mxu0 %v3037_v28 }
 0x3a1   : > { %6337 = vmatmul.mubr.f32.gmra.mrb[32].mxu0 %v3047_v39 }
 0x3a2   : > { %6343 = vmatprep.mubr.f32.mxu0 %v8175_v50 }
 0x3a5   : > { %6344 = vmatmul.mubr.f32.vlgmr.msra.gmra.mrb[18].mxu0 %v8172_v19 }
 0x3a6   : > { %6802 = vmatpush3.bf16.msra.mxu0 %v8151_v48  ;;  %6346 = vmatprep.mubr.f32.mxu0 %v8187_v14  ;;  %v3952_v48 = vld [vmem:[%s8949_s6 + $0x20] sm:$0xff] }
 0x3a7   : > { %v4024_v15 = vand.u32 4294901760, %v3952_v48 }
 0x3a9   : > { %6347 = vmatmul.mubr.f32.gmra.mrb[20].mxu0 %v8181_v41  ;;  %v8483_v24 = vpack.c.bf16 %v4027_v8, %v4024_v15  ;;  %v8517_v0 = vsub.f32 %v3952_v48, %v4024_v15 }
 0x3aa   : > { %6349 = vmatprep.mubr.f32.mxu0 %v8206_v61 }
 0x3ab   : > { %6812 = vmatprep.subr.bf16.mxu1 %v8483_v24  ;;  %v8978_v52 = vand.u32 4294901760, %v8517_v0  ;;  %v8552_v36 = vpack.c.bf16 %v8519_v10, %v8517_v0 }
 0x3ac   : > { %6814 = vmatpush3.bf16.msra.mxu1 %v8483_v24 }
 0x3ad   : > { %6350 = vmatmul.mubr.f32.gmra.mrb[22].mxu0 %v8199_v40  ;;  %v4276_v57 = vsub.f32 %v8517_v0, %v8978_v52 }
 0x3ae   : > { %6352 = vmatprep.mubr.f32.mxu0 %v8229_v38 }
 0x3af   : > { %v4277_v43 = vand.u32 4294901760, %v4276_v57 }
 0x3b1   : > { %6353 = vmatmul.mubr.f32.gmra.mrb[24].mxu0 %v8222_v33 }
 0x3b2   : > { %6355 = vmatprep.mubr.f32.mxu0 %v8250_v46 }
 0x3b5   : > { %6356 = vmatmul.mubr.f32.gmra.mrb[26].mxu0 %v8245_v1 }
 0x3b6   : > { %6358 = vmatprep.mubr.f32.mxu0 %v8270_v42 }
 0x3b9   : > { %6359 = vmatmul.mubr.f32.gmra.mrb[28].mxu0 %v8263_v53 }
 0x3ba   : > { %6361 = vmatprep.mubr.f32.mxu0 %v8290_v51 }
 0x3bd   : > { %6362 = vmatmul.mubr.f32.gmra.mrb[30].mxu0 %v8286_v7 }
 0x3be   : > { %6364 = vmatprep.mubr.f32.mxu0 %v8310_v34 }
 0x3c1   : > { %6365 = vmatmul.mubr.f32.gmra.mrb[32].mxu0 %v8303_v13 }
 0x3c2   : > { %6371 = vmatprep.mubr.f32.mxu0 %v8175_v50  ;;  %v3955_v50 = vld [vmem:[%s8949_s6 + $0x38] sm:$0xff] }
 0x3c5   : > { %6372 = vmatmul.mubr.f32.vlgmr.msra.gmra.mrb[18].mxu0 %v8172_v19  ;;  %v3954_v19 = vld [vmem:[%s8949_s6 + $0x30] sm:$0xff] }
 0x3c6   : > { %6374 = vmatprep.mubr.f32.mxu0 %v8187_v14  ;;  %v4030_v58 = vand.u32 4294901760, %v3954_v19  ;;  %v8500_v14 = vsub.f32 %v8353_v6, %v4012_v47  ;;  %v4269_v47 = vsub.f32 %v8566_v44, %v4268_v9 }
 0x3c8   : > { %v4247_v11 = vand.u32 4294901760, %v8500_v14  ;;  %v8530_v16 = vsub.f32 %v3954_v19, %v4030_v58  ;;  %v8548_v63 = vpack.c.bf16 %v8505_v26, %v8500_v14 }
 0x3c9   : > { %6375 = vmatmul.mubr.f32.gmra.mrb[20].mxu0 %v8181_v41  ;;  %v4033_v41 = vand.u32 4294901760, %v3955_v50 }
 0x3ca   : > { %6377 = vmatprep.mubr.f32.mxu0 %v8206_v61  ;;  %v4248_v25 = vsub.f32 %v8500_v14, %v4247_v11  ;;  %v8971_v12 = vand.u32 4294901760, %v8530_v16 }
 0x3cb   : > { %v8493_v3 = vpack.c.bf16 %v4033_v41, %v4030_v58  ;;  %v8532_v32 = vsub.f32 %v3955_v50, %v4033_v41 }
 0x3cc   : > { %v4290_v5 = vsub.f32 %v8530_v16, %v8971_v12 }
 0x3cd   : > { %6378 = vmatmul.mubr.f32.gmra.mrb[22].mxu0 %v8199_v40  ;;  %6816 = vmatprep.subr.bf16.mxu1 %v8493_v3  ;;  %v4249_v40 = vand.u32 4294901760, %v4248_v25  ;;  %v8556_v4 = vpack.c.bf16 %v8532_v32, %v8530_v16  ;;  %v4270_v25 = vand.u32 4294901760, %v4269_v47 }
 0x3ce   : > { %6380 = vmatprep.mubr.f32.mxu0 %v8229_v38  ;;  %6818 = vmatpush3.bf16.msra.mxu1 %v8493_v3 }
 0x3cf   : > { %v8515_v61 = vpack.c.bf16 %v4256_v60, %v4249_v40 }
 0x3d1   : > { %6381 = vmatmul.mubr.f32.gmra.mrb[24].mxu0 %v8222_v33  ;;  %6820 = vmatprep.subr.bf16.mxu1 %v8515_v61  ;;  %v8976_v33 = vand.u32 4294901760, %v8519_v10 }
 0x3d2   : > { %6383 = vmatprep.mubr.f32.mxu0 %v8250_v46  ;;  %v8970_v46 = vand.u32 4294901760, %v8532_v32 }
 0x3d3   : > { %v4283_v38 = vsub.f32 %v8519_v10, %v8976_v33 }
 0x3d4   : > { %v4297_v22 = vsub.f32 %v8532_v32, %v8970_v46 }
 0x3d5   : > { %6384 = vmatmul.mubr.f32.gmra.mrb[26].mxu0 %v8245_v1  ;;  %v4284_v1 = vand.u32 4294901760, %v4283_v38 }
 0x3d6   : > { %6386 = vmatprep.mubr.f32.mxu0 %v8270_v42  ;;  %v4298_v27 = vand.u32 4294901760, %v4297_v22 }
 0x3d7   : > { %v8536_v35 = vpack.c.bf16 %v4284_v1, %v4277_v43 }
 0x3d9   : > { %6387 = vmatmul.mubr.f32.gmra.mrb[28].mxu0 %v8263_v53  ;;  %v4291_v53 = vand.u32 4294901760, %v4290_v5 }
 0x3da   : > { %6389 = vmatprep.mubr.f32.mxu0 %v8290_v51  ;;  %v8571_v51 = vld [vmem:[%s8948_s5] ss:$0 sm:$0xff] }
 0x3db   : > { %v8544_v42 = vpack.c.bf16 %v4298_v27, %v4291_v53 }
 0x3dd   : > { %6390 = vmatmul.mubr.f32.gmra.mrb[30].mxu0 %v8286_v7  ;;  %v8561_v7 = vsub.f32 %v8363_v45, %v4018_v37 }
 0x3de   : > { %6392 = vmatprep.mubr.f32.mxu0 %v8310_v34 }
 0x3df   : > { %v4261_v17 = vand.u32 4294901760, %v8561_v7 }
 0x3e1   : > { %6393 = vmatmul.mubr.f32.gmra.mrb[32].mxu0 %v8303_v13  ;;  %v4262_v28 = vsub.f32 %v8561_v7, %v4261_v17  ;;  %v6871_v14 = vpack.c.bf16 %v4268_v9, %v4261_v17  ;;  %v9011_v17 = vand.u32 4294901760, %v8532_v32 }
 0x3e3   : > { %v4263_v8 = vand.u32 4294901760, %v4262_v28 }
 0x498   : > { %v6373_v23 = vpop.f32.mrb[18].mxu0 }
 0x499   : > { %v6925_v18 = vadd.f32 %v6373_v23, %v8571_v51  ;;  %v3838_v13 = vpop.f32.mrb[19].mxu0 }
 0x49a   : > { %v6926_v34 = vadd.f32 %v8571_v51, %v3838_v13 }
 0x49b   : > { %v3933_v29 = vmax.f32 %v6925_v18, 0.0 }
 0x49c   : > { %v3932_v30 = vmax.f32 %v6926_v34, 0.0  ;;  %v6376_v39 = vpop.f32.mrb[20].mxu0 }
 0x49d   : > { %v3967_v6 = vsel %vm1539_vm1, %v3933_v29, 0  ;;  %v6927_v55 = vadd.f32 %v6376_v39, %v8571_v51  ;;  %v3850_v45 = vpop.f32.mrb[21].mxu0 }
 0x49e   : > { %v8585_v56 = vand.u32 4294901760, %v3967_v6  ;;  %v3964_v20 = vsel %vm1539_vm1, %v3932_v30, 0  ;;  %v6928_v37 = vadd.f32 %v8571_v51, %v3850_v45 }
 0x49f   : > { %v8589_v59 = vand.u32 4294901760, %v3964_v20  ;;  %v3935_v54 = vmax.f32 %v6927_v55, 0.0 }
 0x4a0   : > { %v8592_v48 = vsub.f32 %v3967_v6, %v8585_v56  ;;  %v3934_v2 = vmax.f32 %v6928_v37, 0.0  ;;  %v6379_v15 = vpop.f32.mrb[22].mxu0  ;;  %v6823_v6 = vpack.c.bf16 %v4270_v25, %v4263_v8 }
 0x4a1   : > { %v8595_v19 = vsub.f32 %v3964_v20, %v8589_v59  ;;  %v3973_v50 = vsel %vm1539_vm1, %v3935_v54, 0  ;;  %v6929_v58 = vadd.f32 %v6379_v15, %v8571_v51  ;;  %v3862_v41 = vpop.f32.mrb[23].mxu0 }
 0x4a2   : > { %v8984_v31 = vand.u32 4294901760, %v8592_v48  ;;  %v8600_v40 = vand.u32 4294901760, %v3973_v50  ;;  %v3970_v60 = vsel %vm1539_vm1, %v3934_v2, 0  ;;  %v6930_v57 = vadd.f32 %v8571_v51, %v3862_v41 }
 0x4a3   : > { %v8604_v38 = vand.u32 4294901760, %v3970_v60  ;;  %v3937_v43 = vmax.f32 %v6929_v58, 0.0  ;;  %v4086_v1 = vand.u32 4294901760, %v8595_v19  ;;  %v9004_v26 = vand.u32 4294901760, %v8592_v48 }
 0x4a4   : > { %v4097_v5 = vsub.f32 %v8592_v48, %v8984_v31  ;;  %v8611_v22 = vsub.f32 %v3973_v50, %v8600_v40  ;;  %v3936_v53 = vmax.f32 %v6930_v57, 0.0  ;;  %v6382_v27 = vpop.f32.mrb[24].mxu0 }
 0x4a5   : > { %v8614_v23 = vsub.f32 %v3970_v60, %v8604_v38  ;;  %v3979_v18 = vsel %vm1539_vm1, %v3937_v43, 0  ;;  %v6931_v13 = vadd.f32 %v6382_v27, %v8571_v51  ;;  %v3874_v34 = vpop.f32.mrb[25].mxu0  ;;  %v4087_v29 = vsub.f32 %v8595_v19, %v4086_v1 }
 0x4a6   : > { %v8621_v30 = vand.u32 4294901760, %v3979_v18  ;;  %v3976_v39 = vsel %vm1539_vm1, %v3936_v53, 0  ;;  %v6932_v28 = vadd.f32 %v8571_v51, %v3874_v34  ;;  %v4098_v37 = vand.u32 4294901760, %v4097_v5 }
 0x4a7   : > { %v8625_v55 = vand.u32 4294901760, %v3976_v39  ;;  %v3939_v45 = vmax.f32 %v6931_v13, 0.0  ;;  %v4088_v47 = vand.u32 4294901760, %v4087_v29  ;;  %v8980_v20 = vand.u32 4294901760, %v8614_v23 }
 0x4a8   : > { %v8629_v54 = vsub.f32 %v3979_v18, %v8621_v30  ;;  %v3938_v2 = vmax.f32 %v6932_v28, 0.0  ;;  %v6385_v15 = vpop.f32.mrb[26].mxu0  ;;  %v8975_v50 = vand.u32 4294901760, %v8611_v22 }
 0x4a9   : > { %v8633_v58 = vsub.f32 %v3976_v39, %v8625_v55  ;;  %v3985_v41 = vsel %vm1539_vm1, %v3939_v45, 0  ;;  %v6933_v8 = vadd.f32 %v6385_v15, %v8571_v51  ;;  %v3886_v25 = vpop.f32.mrb[27].mxu0  ;;  %6411 = vmatprep.mubr.f32.mxu1 %v4088_v47  ;;  %v4107_v60 = vsub.f32 %v8614_v23, %v8980_v20 }
 0x4aa   : > { %v8640_v57 = vand.u32 4294901760, %v3985_v41  ;;  %v3982_v43 = vsel %vm1539_vm1, %v3938_v2, 0  ;;  %v6934_v5 = vadd.f32 %v8571_v51, %v3886_v25  ;;  %6412 = vmatmul.mubr.f32.vlgmr.msra.gmra.mrb[16].mxu1 %v4098_v37  ;;  %v4117_v53 = vsub.f32 %v8611_v22, %v8975_v50 }
 0x4ab   : > { %v8647_v27 = vand.u32 4294901760, %v3982_v43  ;;  %v3941_v18 = vmax.f32 %v6933_v8, 0.0  ;;  %6822 = vmatpush3.bf16.msra.mxu1 %v8515_v61  ;;  %v4108_v13 = vand.u32 4294901760, %v4107_v60  ;;  %v8973_v34 = vand.u32 4294901760, %v8633_v58 }
 0x4ac   : > { %v8652_v29 = vsub.f32 %v3985_v41, %v8640_v57  ;;  %v3940_v39 = vmax.f32 %v6934_v5, 0.0  ;;  %v6388_v28 = vpop.f32.mrb[28].mxu0  ;;  %v4118_v45 = vand.u32 4294901760, %v4117_v53  ;;  %6824 = vmatprep.subr.bf16.mxu1 %v6823_v6  ;;  %v8972_v47 = vand.u32 4294901760, %v8629_v54 }
 0x4ad   : > { %v8656_v37 = vsub.f32 %v3982_v43, %v8647_v27  ;;  %v3991_v2 = vsel %vm1539_vm1, %v3941_v18, 0  ;;  %v6935_v15 = vadd.f32 %v6388_v28, %v8571_v51  ;;  %v3898_v61 = vpop.f32.mrb[29].mxu0  ;;  %6414 = vmatprep.mubr.f32.mxu1 %v4108_v13  ;;  %v4127_v41 = vsub.f32 %v8633_v58, %v8973_v34 }
 0x4ae   : > { %v8663_v8 = vand.u32 4294901760, %v3991_v2  ;;  %v3988_v25 = vsel %vm1539_vm1, %v3940_v39, 0  ;;  %v6936_v60 = vadd.f32 %v8571_v51, %v3898_v61  ;;  %6415 = vmatmul.mubr.f32.gmra.mrb[18].mxu1 %v4118_v45  ;;  %v4137_v43 = vsub.f32 %v8629_v54, %v8972_v47 }
 0x4af   : > { %v8670_v5 = vand.u32 4294901760, %v3988_v25  ;;  %v3943_v53 = vmax.f32 %v6935_v15, 0.0  ;;  %v4128_v18 = vand.u32 4294901760, %v4127_v41  ;;  %6826 = vmatpush3.bf16.msra.mxu1 %v6823_v6  ;;  %v8974_v13 = vand.u32 4294901760, %v8656_v37 }
 0x4b0   : > { %v8674_v28 = vsub.f32 %v3991_v2, %v8663_v8  ;;  %v3942_v46 = vmax.f32 %v6936_v60, 0.0  ;;  %v6391_v12 = vpop.f32.mrb[30].mxu0  ;;  %v4138_v39 = vand.u32 4294901760, %v4137_v43  ;;  %v8977_v61 = vand.u32 4294901760, %v8652_v29  ;;  %6828 = vmatprep.subr.bf16.mxu1 %v8536_v35 }
 0x4b1   : > { %v8679_v45 = vsub.f32 %v3988_v25, %v8670_v5  ;;  %v3997_v47 = vsel %vm1539_vm1, %v3943_v53, 0  ;;  %v6937_v15 = vadd.f32 %v6391_v12, %v8571_v51  ;;  %v3910_v6 = vpop.f32.mrb[31].mxu0  ;;  %6417 = vmatprep.mubr.f32.mxu1 %v4128_v18  ;;  %v4147_v2 = vsub.f32 %v8656_v37, %v8974_v13 }
 0x4b2   : > { %v8686_v41 = vand.u32 4294901760, %v3997_v47  ;;  %v3994_v60 = vsel %vm1539_vm1, %v3942_v46, 0  ;;  %v6938_v43 = vadd.f32 %v8571_v51, %v3910_v6  ;;  %6418 = vmatmul.mubr.f32.gmra.mrb[20].mxu1 %v4138_v39  ;;  %v4157_v25 = vsub.f32 %v8652_v29, %v8977_v61 }
 0x4b3   : > { %v8693_v53 = vand.u32 4294901760, %v3994_v60  ;;  %v3945_v12 = vmax.f32 %v6937_v15, 0.0  ;;  %v4148_v34 = vand.u32 4294901760, %v4147_v2  ;;  %v8979_v18 = vand.u32 4294901760, %v8679_v45  ;;  %6830 = vmatpush3.bf16.msra.mxu1 %v8536_v35 }
 0x4b4   : > { %v8698_v13 = vsub.f32 %v3997_v47, %v8686_v41  ;;  %v3944_v50 = vmax.f32 %v6938_v43, 0.0  ;;  %v6394_v46 = vpop.f32.mrb[32].mxu0  ;;  %v4158_v33 = vand.u32 4294901760, %v4157_v25  ;;  %v8983_v39 = vand.u32 4294901760, %v8674_v28  ;;  %6832 = vmatprep.subr.bf16.mxu1 %v8544_v42 }
 0x4b5   : > { %v8703_v6 = vsub.f32 %v3994_v60, %v8693_v53  ;;  %v4003_v15 = vsel %vm1539_vm1, %v3945_v12, 0  ;;  %v6939_v2 = vadd.f32 %v6394_v46, %v8571_v51  ;;  %v3922_v61 = vpop.f32.mrb[33].mxu0  ;;  %6420 = vmatprep.mubr.f32.mxu1 %v4148_v34  ;;  %v4167_v35 = vsub.f32 %v8679_v45, %v8979_v18 }
 0x4b6   : > { %v8710_v47 = vand.u32 4294901760, %v4003_v15  ;;  %v4000_v43 = vsel %vm1539_vm1, %v3944_v50, 0  ;;  %v6940_v25 = vadd.f32 %v8571_v51, %v3922_v61  ;;  %6421 = vmatmul.mubr.f32.gmra.mrb[22].mxu1 %v4158_v33  ;;  %v4177_v60 = vsub.f32 %v8674_v28, %v8983_v39 }
 0x4b7   : > { %v8717_v12 = vand.u32 4294901760, %v4000_v43  ;;  %v3947_v46 = vmax.f32 %v6939_v2, 0.0  ;;  %v4168_v52 = vand.u32 4294901760, %v4167_v35  ;;  %v8981_v34 = vand.u32 4294901760, %v8703_v6  ;;  %6834 = vmatpush3.bf16.msra.mxu1 %v8544_v42 }
 0x4b8   : > { %v8722_v18 = vsub.f32 %v4003_v15, %v8710_v47  ;;  %v3946_v20 = vmax.f32 %v6940_v25, 0.0  ;;  %v4178_v50 = vand.u32 4294901760, %v4177_v60  ;;  %v8982_v51 = vand.u32 4294901760, %v8698_v13  ;;  %6836 = vmatprep.subr.bf16.mxu1 %v8548_v63 }
 0x4b9   : > { %v8727_v33 = vsub.f32 %v4000_v43, %v8717_v12  ;;  %v4009_v61 = vsel %vm1539_vm1, %v3947_v46, 0  ;;  %6423 = vmatprep.mubr.f32.mxu1 %v4168_v52  ;;  %v4187_v2 = vsub.f32 %v8703_v6, %v8981_v34  ;;  %v9017_v32 = vand.u32 4294901760, %v8703_v6 }
 0x4ba   : > { %v8733_v42 = vand.u32 4294901760, %v4009_v61  ;;  %v4006_v15 = vsel %vm1539_vm1, %v3946_v20, 0  ;;  %6424 = vmatmul.mubr.f32.gmra.mrb[24].mxu1 %v4178_v50  ;;  %v4197_v35 = vsub.f32 %v8698_v13, %v8982_v51  ;;  %v8985_v25 = vand.u32 4294901760, %v8722_v18 }
 0x4bb   : > { %v8740_v43 = vand.u32 4294901760, %v4006_v15  ;;  %v4188_v60 = vand.u32 4294901760, %v4187_v2  ;;  %v4206_v52 = vand.u32 4294901760, %v8727_v33 }
 0x4bc   : > { %v8744_v46 = vsub.f32 %v4009_v61, %v8733_v42  ;;  %v4198_v34 = vand.u32 4294901760, %v4197_v35  ;;  %v4217_v20 = vsub.f32 %v8722_v18, %v8985_v25 }
 0x4bd   : > { %v8750_v50 = vsub.f32 %v4006_v15, %v8740_v43  ;;  %6426 = vmatprep.mubr.f32.mxu1 %v4188_v60  ;;  %v4207_v51 = vsub.f32 %v8727_v33, %v4206_v52 }
 0x4be   : > { %6427 = vmatmul.mubr.f32.gmra.mrb[26].mxu1 %v4198_v34  ;;  %v4236_v2 = vand.u32 4294901760, %v8744_v46  ;;  %v4218_v31 = vand.u32 4294901760, %v4217_v20  ;;  %v6839_v34 = vpack.c.bf16 %v8566_v44, %v8561_v7  ;;  %v9009_v7 = vand.u32 4294901760, %v8633_v58 }
 0x4bf   : > { %v4208_v39 = vand.u32 4294901760, %v4207_v51  ;;  %v4226_v61 = vand.u32 4294901760, %v8750_v50  ;;  %v9010_v44 = vand.u32 4294901760, %v8530_v16  ;;  %v9016_v16 = vand.u32 4294901760, %v8674_v28 }
 0x4c0   : > { %v4237_v35 = vsub.f32 %v8744_v46, %v4236_v2 }
 0x4c1   : > { %6429 = vmatprep.mubr.f32.mxu1 %v4208_v39  ;;  %v4227_v15 = vsub.f32 %v8750_v50, %v4226_v61  ;;  %v6879_v9 = vpack.c.bf16 %v9011_v17, %v9010_v44 }
 0x4c2   : > { %6430 = vmatmul.mubr.f32.gmra.mrb[28].mxu1 %v4218_v31  ;;  %v4238_v25 = vand.u32 4294901760, %v4237_v35  ;;  %v9015_v31 = vand.u32 4294901760, %v8679_v45 }
 0x4c3   : > { %v4228_v60 = vand.u32 4294901760, %v4227_v15 }
 0x4c5   : > { %6432 = vmatprep.mubr.f32.mxu1 %v4228_v60 }
 0x4c6   : > { %6433 = vmatmul.mubr.f32.gmra.mrb[30].mxu1 %v4238_v25 }
 0x4c7   : > { %6451 = vmatprep.mubr.f32.mxu1 %v8589_v59 }
 0x4ca   : > { %6452 = vmatmul.mubr.f32.vlgmr.msra.gmra.mrb[16].mxu1 %v8585_v56 }
 0x4cb   : > { %6838 = vmatpush3.bf16.msra.mxu1 %v8548_v63  ;;  %6454 = vmatprep.mubr.f32.mxu1 %v8604_v38  ;;  %v6867_v63 = vpack.c.bf16 %v4254_v21, %v4247_v11  ;;  %v9005_v11 = vand.u32 4294901760, %v8614_v23  ;;  %v9006_v21 = vand.u32 4294901760, %v8517_v0  ;;  %v9013_v0 = vand.u32 4294901760, %v8656_v37 }
 0x4cc   : > { %6840 = vmatprep.subr.bf16.mxu1 %v6839_v34 }
 0x4ce   : > { %6455 = vmatmul.mubr.f32.gmra.mrb[18].mxu1 %v8600_v40 }
 0x4cf   : > { %6457 = vmatprep.mubr.f32.mxu1 %v8625_v55  ;;  %6842 = vmatpush3.bf16.msra.mxu1 %v6839_v34 }
 0x4d0   : > { %6844 = vmatprep.subr.bf16.mxu1 %v8552_v36 }
 0x4d2   : > { %6458 = vmatmul.mubr.f32.gmra.mrb[20].mxu1 %v8621_v30 }
 0x4d3   : > { %6460 = vmatprep.mubr.f32.mxu1 %v8647_v27  ;;  %6846 = vmatpush3.bf16.msra.mxu1 %v8552_v36  ;;  %v9007_v36 = vand.u32 4294901760, %v8519_v10  ;;  %v9014_v10 = vand.u32 4294901760, %v8652_v29 }
 0x4d4   : > { %6848 = vmatprep.subr.bf16.mxu1 %v8556_v4 }
 0x4d6   : > { %6461 = vmatmul.mubr.f32.gmra.mrb[22].mxu1 %v8640_v57 }
 0x4d7   : > { %6463 = vmatprep.mubr.f32.mxu1 %v8670_v5  ;;  %6850 = vmatpush3.bf16.msra.mxu1 %v8556_v4  ;;  %v6875_v4 = vpack.c.bf16 %v9007_v36, %v9006_v21 }
 0x4d8   : > { %6852 = vmatprep.subr.bf16.mxu1 %v8383_v49 }
 0x4da   : > { %6464 = vmatmul.mubr.f32.gmra.mrb[24].mxu1 %v8663_v8 }
 0x4db   : > { %6466 = vmatprep.mubr.f32.mxu1 %v8693_v53 }
 0x4de   : > { %6467 = vmatmul.mubr.f32.gmra.mrb[26].mxu1 %v8686_v41 }
 0x4df   : > { %6469 = vmatprep.mubr.f32.mxu1 %v8717_v12 }
 0x4e2   : > { %6470 = vmatmul.mubr.f32.gmra.mrb[28].mxu1 %v8710_v47 }
 0x4e3   : > { %6472 = vmatprep.mubr.f32.mxu1 %v8740_v43 }
 0x4e6   : > { %6473 = vmatmul.mubr.f32.gmra.mrb[30].mxu1 %v8733_v42 }
 0x4e7   : > { %6491 = vmatprep.mubr.f32.mxu1 %v8595_v19  ;;  %v9008_v19 = vand.u32 4294901760, %v8611_v22 }
 0x4ea   : > { %6492 = vmatmul.mubr.f32.vlgmr.msra.gmra.mrb[16].mxu1 %v8592_v48  ;;  %v9012_v48 = vand.u32 4294901760, %v8629_v54 }
 0x4eb   : > { %6854 = vmatpush3.bf16.msra.mxu1 %v8383_v49  ;;  %6494 = vmatprep.mubr.f32.mxu1 %v8614_v23 }
 0x4ec   : > { %6856 = vmatprep.subr.bf16.mxu1 %v8390_v62 }
 0x4ee   : > { %6495 = vmatmul.mubr.f32.gmra.mrb[18].mxu1 %v8611_v22  ;;  %v9019_v22 = vand.u32 4294901760, %v8722_v18 }
 0x4ef   : > { %6497 = vmatprep.mubr.f32.mxu1 %v8633_v58  ;;  %6858 = vmatpush3.bf16.msra.mxu1 %v8390_v62 }
 0x4f0   : > { %6860 = vmatprep.subr.bf16.mxu1 %v8483_v24 }
 0x4f2   : > { %6498 = vmatmul.mubr.f32.gmra.mrb[20].mxu1 %v8629_v54 }
 0x4f3   : > { %6500 = vmatprep.mubr.f32.mxu1 %v8656_v37  ;;  %6862 = vmatpush3.bf16.msra.mxu1 %v8483_v24 }
 0x4f4   : > { %6864 = vmatprep.subr.bf16.mxu1 %v8493_v3 }
 0x4f6   : > { %6501 = vmatmul.mubr.f32.gmra.mrb[22].mxu1 %v8652_v29 }
 0x4f7   : > { %6503 = vmatprep.mubr.f32.mxu1 %v8679_v45  ;;  %6866 = vmatpush3.bf16.msra.mxu1 %v8493_v3 }
 0x4f8   : > { %6868 = vmatprep.subr.bf16.mxu1 %v6867_v63 }
 0x4fa   : > { %6504 = vmatmul.mubr.f32.gmra.mrb[24].mxu1 %v8674_v28 }
 0x4fb   : > { %6506 = vmatprep.mubr.f32.mxu1 %v8703_v6 }
 0x4fe   : > { %6507 = vmatmul.mubr.f32.gmra.mrb[26].mxu1 %v8698_v13 }
 0x4ff   : > { %6509 = vmatprep.mubr.f32.mxu1 %v8727_v33 }
 0x502   : > { %6510 = vmatmul.mubr.f32.gmra.mrb[28].mxu1 %v8722_v18 }
 0x503   : > { %6512 = vmatprep.mubr.f32.mxu1 %v8750_v50 }
 0x506   : > { %6513 = vmatmul.mubr.f32.gmra.mrb[30].mxu1 %v8744_v46 }
 0x507   : > { %6531 = vmatprep.mubr.f32.mxu1 %v4086_v1  ;;  %v9018_v1 = vand.u32 4294901760, %v8698_v13 }
 0x50a   : > { %6532 = vmatmul.mubr.f32.vlgmr.msra.gmra.mrb[16].mxu1 %v9004_v26 }
 0x50b   : > { %6870 = vmatpush3.bf16.msra.mxu1 %v6867_v63  ;;  %6534 = vmatprep.mubr.f32.mxu1 %v9005_v11 }
 0x50c   : > { %6872 = vmatprep.subr.bf16.mxu1 %v6871_v14 }
 0x50e   : > { %6535 = vmatmul.mubr.f32.gmra.mrb[18].mxu1 %v9008_v19 }
 0x50f   : > { %6537 = vmatprep.mubr.f32.mxu1 %v9009_v7  ;;  %6874 = vmatpush3.bf16.msra.mxu1 %v6871_v14 }
 0x510   : > { %6876 = vmatprep.subr.bf16.mxu1 %v6875_v4 }
 0x512   : > { %6538 = vmatmul.mubr.f32.gmra.mrb[20].mxu1 %v9012_v48 }
 0x513   : > { %6540 = vmatprep.mubr.f32.mxu1 %v9013_v0  ;;  %6878 = vmatpush3.bf16.msra.mxu1 %v6875_v4 }
 0x514   : > { %6880 = vmatprep.subr.bf16.mxu1 %v6879_v9 }
 0x516   : > { %6541 = vmatmul.mubr.f32.gmra.mrb[22].mxu1 %v9014_v10 }
 0x517   : > { %6543 = vmatprep.mubr.f32.mxu1 %v9015_v31  ;;  %6882 = vmatpush3.bf16.msra.mxu1 %v6879_v9 }
 0x518   : > { %6884 = vmatprep.subr.bf16.mxu1 %v8383_v49 }
 0x51a   : > { %6544 = vmatmul.mubr.f32.gmra.mrb[24].mxu1 %v9016_v16 }
 0x51b   : > { %6546 = vmatprep.mubr.f32.mxu1 %v9017_v32 }
 0x51e   : > { %6547 = vmatmul.mubr.f32.gmra.mrb[26].mxu1 %v9018_v1 }
 0x51f   : > { %6549 = vmatprep.mubr.f32.mxu1 %v4206_v52 }
 0x522   : > { %6550 = vmatmul.mubr.f32.gmra.mrb[28].mxu1 %v9019_v22 }
 0x523   : > { %6552 = vmatprep.mubr.f32.mxu1 %v4226_v61 }
 0x526   : > { %6553 = vmatmul.mubr.f32.gmra.mrb[30].mxu1 %v4236_v2 }
 0x527   : > { %6571 = vmatprep.mubr.f32.mxu1 %v8589_v59 }
 0x52a   : > { %6572 = vmatmul.mubr.f32.vlgmr.msra.gmra.mrb[16].mxu1 %v8585_v56 }
 0x52b   : > { %6886 = vmatpush3.bf16.msra.mxu1 %v8383_v49  ;;  %6574 = vmatprep.mubr.f32.mxu1 %v8604_v38  ;;  %v5276_v49 = vld [vmem:[%s8950_s7] ss:$0 sm:$0xff] }
 0x52c   : > { %6888 = vmatprep.subr.bf16.mxu1 %v8390_v62 }
 0x52e   : > { %6575 = vmatmul.mubr.f32.gmra.mrb[18].mxu1 %v8600_v40 }
 0x52f   : > { %6577 = vmatprep.mubr.f32.mxu1 %v8625_v55  ;;  %6890 = vmatpush3.bf16.msra.mxu1 %v8390_v62 }
 0x530   : > { %6892 = vmatprep.subr.bf16.mxu1 %v8483_v24 }
 0x532   : > { %6578 = vmatmul.mubr.f32.gmra.mrb[20].mxu1 %v8621_v30 }
 0x533   : > { %6580 = vmatprep.mubr.f32.mxu1 %v8647_v27  ;;  %6894 = vmatpush3.bf16.msra.mxu1 %v8483_v24 }
 0x534   : > { %6896 = vmatprep.subr.bf16.mxu1 %v8493_v3 }
 0x536   : > { %6581 = vmatmul.mubr.f32.gmra.mrb[22].mxu1 %v8640_v57 }
 0x537   : > { %6583 = vmatprep.mubr.f32.mxu1 %v8670_v5  ;;  %6898 = vmatpush3.bf16.msra.mxu1 %v8493_v3 }
 0x53a   : > { %6584 = vmatmul.mubr.f32.gmra.mrb[24].mxu1 %v8663_v8 }
 0x53b   : > { %6586 = vmatprep.mubr.f32.mxu1 %v8693_v53 }
 0x53e   : > { %6587 = vmatmul.mubr.f32.gmra.mrb[26].mxu1 %v8686_v41 }
 0x53f   : > { %6589 = vmatprep.mubr.f32.mxu1 %v8717_v12 }
 0x542   : > { %6590 = vmatmul.mubr.f32.gmra.mrb[28].mxu1 %v8710_v47 }
 0x543   : > { %6592 = vmatprep.mubr.f32.mxu1 %v8740_v43 }
 0x546   : > { %6593 = vmatmul.mubr.f32.gmra.mrb[30].mxu1 %v8733_v42 }
 0x547   : > { %6611 = vmatprep.mubr.f32.mxu1 %v8589_v59 }
 0x54a   : > { %6612 = vmatmul.mubr.f32.vlgmr.msra.gmra.mrb[16].mxu1 %v8585_v56 }
 0x54b   : > { %6614 = vmatprep.mubr.f32.mxu1 %v8604_v38 }
 0x54e   : > { %6615 = vmatmul.mubr.f32.gmra.mrb[18].mxu1 %v8600_v40 }
 0x54f   : > { %6617 = vmatprep.mubr.f32.mxu1 %v8625_v55 }
 0x552   : > { %6618 = vmatmul.mubr.f32.gmra.mrb[20].mxu1 %v8621_v30 }
 0x553   : > { %6620 = vmatprep.mubr.f32.mxu1 %v8647_v27 }
 0x556   : > { %6621 = vmatmul.mubr.f32.gmra.mrb[22].mxu1 %v8640_v57 }
 0x557   : > { %6623 = vmatprep.mubr.f32.mxu1 %v8670_v5 }
 0x55a   : > { %6624 = vmatmul.mubr.f32.gmra.mrb[24].mxu1 %v8663_v8 }
 0x55b   : > { %6626 = vmatprep.mubr.f32.mxu1 %v8693_v53 }
 0x55e   : > { %6627 = vmatmul.mubr.f32.gmra.mrb[26].mxu1 %v8686_v41 }
 0x55f   : > { %6629 = vmatprep.mubr.f32.mxu1 %v8717_v12 }
 0x562   : > { %6630 = vmatmul.mubr.f32.gmra.mrb[28].mxu1 %v8710_v47 }
 0x563   : > { %6632 = vmatprep.mubr.f32.mxu1 %v8740_v43 }
 0x566   : > { %6633 = vmatmul.mubr.f32.gmra.mrb[30].mxu1 %v8733_v42 }
 0x61d   : > { %v6613_v62 = vpop.f32.mrb[16].mxu1 }
 0x61e   : > { %v6941_v24 = vadd.f32 %v6613_v62, %v5276_v49  ;;  %v5099_v3 = vpop.f32.mrb[17].mxu1 }
 0x61f   : > { %v6942_v56 = vadd.f32 %v5276_v49, %v5099_v3 }
 0x620   : > { %5194 = vst.msk [vmem:[%s8906_s26 + $0x8] sm:$0xff] %vm336_vm0, %v6941_v24 }
 0x621   : > { %5193 = vst.msk [vmem:[%s8906_s26] sm:$0xff] %vm336_vm0, %v6942_v56  ;;  %v6616_v59 = vpop.f32.mrb[18].mxu1 }
 0x622   : > { %v6943_v40 = vadd.f32 %v6616_v59, %v5276_v49  ;;  %v5111_v38 = vpop.f32.mrb[19].mxu1 }
 0x623   : > { %v6944_v23 = vadd.f32 %v5276_v49, %v5111_v38 }
 0x624   : > { %5196 = vst.msk [vmem:[%s8906_s26 + $0x18] sm:$0xff] %vm336_vm0, %v6943_v40 }
 0x625   : > { %5195 = vst.msk [vmem:[%s8906_s26 + $0x10] sm:$0xff] %vm336_vm0, %v6944_v23  ;;  %v6619_v30 = vpop.f32.mrb[20].mxu1 }
 0x626   : > { %v6945_v55 = vadd.f32 %v6619_v30, %v5276_v49  ;;  %v5123_v54 = vpop.f32.mrb[21].mxu1 }
 0x627   : > { %v6946_v58 = vadd.f32 %v5276_v49, %v5123_v54 }
 0x628   : > { %5198 = vst.msk [vmem:[%s8906_s26 + $0x28] sm:$0xff] %vm336_vm0, %v6945_v55 }
 0x629   : > { %5197 = vst.msk [vmem:[%s8906_s26 + $0x20] sm:$0xff] %vm336_vm0, %v6946_v58  ;;  %v6622_v57 = vpop.f32.mrb[22].mxu1 }
 0x62a   : > { %v6947_v27 = vadd.f32 %v6622_v57, %v5276_v49  ;;  %v5135_v29 = vpop.f32.mrb[23].mxu1 }
 0x62b   : > { %v6948_v37 = vadd.f32 %v5276_v49, %v5135_v29 }
 0x62c   : > { %5200 = vst.msk [vmem:[%s8906_s26 + $0x38] sm:$0xff] %vm336_vm0, %v6947_v27 }
 0x62d   : > { %5199 = vst.msk [vmem:[%s8906_s26 + $0x30] sm:$0xff] %vm336_vm0, %v6948_v37  ;;  %v6625_v8 = vpop.f32.mrb[24].mxu1 }
 0x62e   : > { %v6949_v5 = vadd.f32 %v6625_v8, %v5276_v49  ;;  %v5147_v13 = vpop.f32.mrb[25].mxu1 }
 0x62f   : > { %v6950_v28 = vadd.f32 %v5276_v49, %v5147_v13 }
 0x630   : > { %5202 = vst.msk [vmem:[%s8906_s26 + $0x48] sm:$0xff] %vm336_vm0, %v6949_v5 }
 0x631   : > { %5201 = vst.msk [vmem:[%s8906_s26 + $0x40] sm:$0xff] %vm336_vm0, %v6950_v28  ;;  %v6628_v45 = vpop.f32.mrb[26].mxu1 }
 0x632   : > { %v6951_v41 = vadd.f32 %v6628_v45, %v5276_v49  ;;  %v5159_v53 = vpop.f32.mrb[27].mxu1 }
 0x633   : > { %v6952_v18 = vadd.f32 %v5276_v49, %v5159_v53 }
 0x634   : > { %5204 = vst.msk [vmem:[%s8906_s26 + $0x58] sm:$0xff] %vm336_vm0, %v6951_v41 }
 0x635   : > { %5203 = vst.msk [vmem:[%s8906_s26 + $0x50] sm:$0xff] %vm336_vm0, %v6952_v18  ;;  %v6631_v39 = vpop.f32.mrb[28].mxu1 }
 0x636   : > { %v6953_v6 = vadd.f32 %v6631_v39, %v5276_v49  ;;  %v5171_v47 = vpop.f32.mrb[29].mxu1 }
 0x637   : > { %v6954_v12 = vadd.f32 %v5276_v49, %v5171_v47 }
 0x638   : > { %5206 = vst.msk [vmem:[%s8906_s26 + $0x68] sm:$0xff] %vm336_vm0, %v6953_v6 }
 0x639   : > { %5205 = vst.msk [vmem:[%s8906_s26 + $0x60] sm:$0xff] %vm336_vm0, %v6954_v12  ;;  %v6634_v51 = vpop.f32.mrb[30].mxu1 }
 0x63a   : > { %v6955_v33 = vadd.f32 %v6634_v51, %v5276_v49  ;;  %v5183_v42 = vpop.f32.mrb[31].mxu1 }
 0x63b   : > { %v6956_v25 = vadd.f32 %v5276_v49, %v5183_v42 }
 0x63c   : > { %5208 = vst.msk [vmem:[%s8906_s26 + $0x78] sm:$0xff] %vm336_vm0, %v6955_v33 }
 0x63d   : > { %5207 = vst.msk [vmem:[%s8906_s26 + $0x70] sm:$0xff] %vm336_vm0, %v6956_v25 }
 0x63e PF: > { %s18_s27 = sadd.s32 1, %s7289_s27  }
 0x63f   : > { %p15_p4 = scmp.ge.s32.totalorder %s18_s27, 6  }
 0x641   :  { %17 = sbr.rel (!%p15_p4) target bundleno = 1 (0x1), region = 82 }

</bundles_post_ra>
